<compile_context>
chip_gen: v6e
topology: v6e:2x2x1
jax: 0.10.0
libtpu: 0.0.40
codegen_flags: <defaults>
</compile_context>

<pallas_src>
import math

import jax
import jax.numpy as jnp
from jax.experimental import pallas as pl
from jax.experimental.pallas import tpu as pltpu

# ---- problem sizes (small, consistent with the module's forward) ----
B, S, H = 2, 8, 32          # batch, seq, hidden_size
NUM_HEAD = 4
DH = H // NUM_HEAD          # dim_head
LN_EPS = 1e-5               # torch.nn.LayerNorm default eps
BS = B * S
NEG = -1e30                 # large finite "minus-infinity" (avoids inf-inf NaN risk)

assert S & (S - 1) == 0, "S must be a power of two for the shift-based batch mask"
assert BS & (BS - 1) == 0, "B*S must be a power of two for the stacked-head mask"
_LOG2_S = int(math.log2(S))

# ---- packed-slab layout ---------------------------------------------------------
SEG = 128                                                    # lane-aligned segment stride
W_QKV1, W_QKV2 = 0 * SEG, 1 * SEG                            # each segment holds (H, 3H)=Q|K|V
W_O1, W_O2, W_F1, W_F2 = 2 * SEG, 3 * SEG, 4 * SEG, 5 * SEG  # wslab = (H, 6*SEG)
# bias slab rows (bslab = (8, SEG); each row holds one bias vector, zero-padded)
R_BQKV1, R_BQKV2, R_BO1, R_BO2, R_BF1, R_BF2, R_LNG, R_LNB = range(8)


# ---------------------------------------------------------------------------------
# math helpers (shared by kernel and pure-JAX reference)
# ---------------------------------------------------------------------------------
def _layer_norm(x, gamma, beta):
    mu = jnp.mean(x, axis=-1, keepdims=True)
    var = jnp.mean((x - mu) ** 2, axis=-1, keepdims=True)
    return (x - mu) * jax.lax.rsqrt(var + LN_EPS) * gamma + beta


def _softmax(s):
    m = jnp.max(s, axis=-1, keepdims=True)
    e = jnp.exp(s - m)
    return e / jnp.sum(e, axis=-1, keepdims=True)


def _gelu(x):
    # TODO(synk): torch.nn.GELU() uses the exact erf formulation; the tanh
    # approximation is used here since erf is not reliably lowered by Mosaic.
    c = math.sqrt(2.0 / math.pi)
    return 0.5 * x * (1.0 + jnp.tanh(c * (x + 0.044715 * x * x * x)))


# ---------------------------------------------------------------------------------
# Pallas kernel: whole decoder layer, all batch elements at once (no grid)
# ---------------------------------------------------------------------------------
def decoder_kernel(x_ref, w_ref, b_ref, out_ref):
    x = x_ref[...]                          # (B*S, H)
    w = w_ref[...]                          # (H, 6*SEG) 128-lane-aligned weight slab
    b = b_ref[...]                          # (8, SEG)   sublane-stacked bias/LN slab

    # Hoisted LayerNorm parameter broadcasts (built once, reused at all 3 sites).
    ln_g = jnp.broadcast_to(b[R_LNG:R_LNG + 1, :H], (BS, H))
    ln_b = jnp.broadcast_to(b[R_LNB:R_LNB + 1, :H], (BS, H))

    def layer_norm(t):
        mu = jnp.mean(t, axis=-1, keepdims=True)
        var = jnp.mean((t - mu) ** 2, axis=-1, keepdims=True)
        return (t - mu) * jax.lax.rsqrt(var + LN_EPS) * ln_g + ln_b

    # Additive score masks, built ONCE at the head-stacked shape (NUM_HEAD*BS, BS):
    # heads stacked along sublanes, batch block-diagonal (+ causal for att1).
    row = jax.lax.broadcasted_iota(jnp.int32, (NUM_HEAD * BS, BS), 0) & (BS - 1)
    col = jax.lax.broadcasted_iota(jnp.int32, (NUM_HEAD * BS, BS), 1)
    same_batch = (row >> _LOG2_S) == (col >> _LOG2_S)
    bias_causal = jnp.where(same_batch & (row >= col), 0.0, NEG).astype(jnp.float32)
    bias_block = jnp.where(same_batch, 0.0, NEG).astype(jnp.float32)

    def attention(x_in, w_qkv_off, b_qkv_row, w_o_off, b_o_row, mask_bias):
        x_ln = layer_norm(x_in)
        # Fused QKV projection: one (BS,H)@(H,3H) matmul (1/sqrt(DH) folded into Q).
        qkv = jnp.dot(x_ln, w[:, w_qkv_off:w_qkv_off + 3 * H],
                      preferred_element_type=jnp.float32)
        qkv = qkv + b[b_qkv_row:b_qkv_row + 1, :3 * H]

        # Per-head scores, stacked along sublanes -> ONE softmax for all heads.
        s = jnp.concatenate([
            jax.lax.dot_general(
                qkv[:, h * DH:(h + 1) * DH],              # q_h (BS, DH)
                qkv[:, H + h * DH:H + (h + 1) * DH],      # k_h (BS, DH)
                (((1,), (1,)), ((), ())),                 # q @ k^T, no transpose op
                preferred_element_type=jnp.float32)
            for h in range(NUM_HEAD)
        ], axis=0)                                        # (NUM_HEAD*BS, BS)
        s = s + mask_bias
        m = jnp.max(s, axis=-1, keepdims=True)
        e = jnp.exp(s - m)
        # approx=False keeps full precision (flip to True to use the EUP vrcp slot).
        p = e * pl.reciprocal(jnp.sum(e, axis=-1, keepdims=True), approx=False)

        wo = w[:, w_o_off:w_o_off + H]                    # (H, H)
        # Accumulator initialized from the output-projection bias (saves one add).
        acc = jnp.broadcast_to(b[b_o_row:b_o_row + 1, :H], (BS, H))
        for h in range(NUM_HEAD):                         # static unrolled
            v = qkv[:, 2 * H + h * DH:2 * H + (h + 1) * DH]
            ho = jnp.dot(p[h * BS:(h + 1) * BS, :], v,    # sublane slice of p (free)
                         preferred_element_type=jnp.float32)
            # Per-head output-projection accumulation (replaces lane concat).
            acc = acc + jnp.dot(ho, wo[h * DH:(h + 1) * DH, :],
                                preferred_element_type=jnp.float32)
        return acc

    # x = x + att1(LN(x))   (masked / causal attention)
    x = x + attention(x, W_QKV1, R_BQKV1, W_O1, R_BO1, bias_causal)
    # x = x + att2(LN(x))   (unmasked attention, batch block-diagonal only)
    x = x + attention(x, W_QKV2, R_BQKV2, W_O2, R_BO2, bias_block)

    # x = x + FFN(LN(x));  dropout is identity in eval mode
    # TODO(synk): torch.nn.Dropout is treated as identity (eval-mode forward).
    y = layer_norm(x)
    y = jnp.dot(y, w[:, W_F1:W_F1 + H],
                preferred_element_type=jnp.float32) + b[R_BF1:R_BF1 + 1, :H]
    y = _gelu(y)
    y = jnp.dot(y, w[:, W_F2:W_F2 + H],
                preferred_element_type=jnp.float32) + b[R_BF2:R_BF2 + 1, :H]

    out_ref[...] = (x + y).astype(out_ref.dtype)


# ---------------------------------------------------------------------------------
# host-side packing (run ONCE at parameter-init time, not in the forward path)
# ---------------------------------------------------------------------------------
def pack_params(p):
    scale = 1.0 / math.sqrt(DH)   # Scale_Dot_Product's 1/sqrt(dim_head), folded into Q

    def heads_w(a):   # (NUM_HEAD, H, DH) -> (H, NUM_HEAD*DH), heads along lanes
        return jnp.swapaxes(a, 0, 1).reshape(H, NUM_HEAD * DH)

    def heads_b(a):   # (NUM_HEAD, 1, DH) -> (1, NUM_HEAD*DH)
        return jnp.swapaxes(a, 0, 1).reshape(1, NUM_HEAD * DH)

    def pad_lanes(a, width=SEG):  # zero-pad each segment to a 128-lane boundary
        return jnp.pad(a, ((0, 0), (0, width - a.shape[1])))

    qkv1_w = jnp.concatenate(
        [heads_w(p["wq1"]) * scale, heads_w(p["wk1"]), heads_w(p["wv1"])], axis=-1)
    qkv2_w = jnp.concatenate(
        [heads_w(p["wq2"]) * scale, heads_w(p["wk2"]), heads_w(p["wv2"])], axis=-1)
    wslab = jnp.concatenate([
        pad_lanes(qkv1_w), pad_lanes(qkv2_w),
        pad_lanes(p["wo1"]), pad_lanes(p["wo2"]),
        pad_lanes(p["wf1"]), pad_lanes(p["wf2"]),
    ], axis=-1)                                                   # (H, 6*SEG)

    qkv1_b = jnp.concatenate(
        [heads_b(p["bq1"]) * scale, heads_b(p["bk1"]), heads_b(p["bv1"])], axis=-1)
    qkv2_b = jnp.concatenate(
        [heads_b(p["bq2"]) * scale, heads_b(p["bk2"]), heads_b(p["bv2"])], axis=-1)
    bslab = jnp.concatenate([
        pad_lanes(r) for r in (qkv1_b, qkv2_b, p["bo1"], p["bo2"],
                               p["bf1"], p["bf2"], p["ln_g"], p["ln_b"])
    ], axis=0)                                                    # (8, SEG)
    return wslab, bslab


@jax.jit
def decoder_layers(x, wslab, bslab):
    x2d = x.reshape(BS, H)
    out2d = pl.pallas_call(
        decoder_kernel,
        out_shape=jax.ShapeDtypeStruct((BS, H), x.dtype),
        # No grid: one invocation, whole arrays resident in VMEM (3 input DMAs).
        in_specs=[pl.BlockSpec(memory_space=pltpu.MemorySpace.VMEM)] * 3,
        out_specs=pl.BlockSpec(memory_space=pltpu.MemorySpace.VMEM),
    )(x2d, wslab, bslab)
    return out2d.reshape(B, S, H)


# ---------------------------------------------------------------------------------
# deterministic parameter init + pure-JAX reference (unfused, per-sample)
# ---------------------------------------------------------------------------------
def init_params(key):
    ks = iter(jax.random.split(key, 32))

    def dense(shape, fan_in):
        return jax.random.normal(next(ks), shape, jnp.float32) / math.sqrt(fan_in)

    p = {
        "ln_g": jnp.ones((1, H), jnp.float32),     # LayerNorm default init
        "ln_b": jnp.zeros((1, H), jnp.float32),
    }
    for i in ("1", "2"):
        p[f"wq{i}"] = dense((NUM_HEAD, H, DH), H)
        p[f"bq{i}"] = dense((NUM_HEAD, 1, DH), H)
        p[f"wk{i}"] = dense((NUM_HEAD, H, DH), H)
        p[f"bk{i}"] = dense((NUM_HEAD, 1, DH), H)
        p[f"wv{i}"] = dense((NUM_HEAD, H, DH), H)
        p[f"bv{i}"] = dense((NUM_HEAD, 1, DH), H)
        p[f"wo{i}"] = dense((H, H), H)
        p[f"bo{i}"] = dense((1, H), H)
    p["wf1"] = dense((H, H), H)
    p["bf1"] = dense((1, H), H)
    p["wf2"] = dense((H, H), H)
    p["bf2"] = dense((1, H), H)
    return p


def _attention_ref(x_ln, wq, bq, wk, bk, wv, bv, wo, bo, causal):
    """Unfused per-head attention (mirrors the PyTorch module structure)."""
    scale = 1.0 / math.sqrt(DH)
    head_outs = []
    for h in range(NUM_HEAD):
        q = x_ln @ wq[h] + bq[h]
        k = x_ln @ wk[h] + bk[h]
        v = x_ln @ wv[h] + bv[h]
        s = (q @ k.T) * scale
        if causal:
            row = jax.lax.broadcasted_iota(jnp.int32, (S, S), 0)
            col = jax.lax.broadcasted_iota(jnp.int32, (S, S), 1)
            s = jnp.where(row >= col, s, -jnp.inf)
        head_outs.append(_softmax(s) @ v)
    cat = jnp.concatenate(head_outs, axis=-1)
    return cat @ wo + bo


def reference(x, p):
    def per_sample(xs):
        y = xs + _attention_ref(
            _layer_norm(xs, p["ln_g"], p["ln_b"]),
            p["wq1"], p["bq1"], p["wk1"], p["bk1"], p["wv1"], p["bv1"],
            p["wo1"], p["bo1"], causal=True)
        y = y + _attention_ref(
            _layer_norm(y, p["ln_g"], p["ln_b"]),
            p["wq2"], p["bq2"], p["wk2"], p["bk2"], p["wv2"], p["bv2"],
            p["wo2"], p["bo2"], causal=False)
        z = _layer_norm(y, p["ln_g"], p["ln_b"])
        z = _gelu(z @ p["wf1"] + p["bf1"])
        z = z @ p["wf2"] + p["bf2"]
        return y + z

    return jax.vmap(per_sample)(x)


if __name__ == "__main__":
    key = jax.random.PRNGKey(0)
    kx, kp = jax.random.split(key)
    x = jax.random.normal(kx, (B, S, H), jnp.float32)
    params = init_params(kp)

    # Slabs are packed ONCE here (init time); the jitted forward takes them directly.
    wslab, bslab = pack_params(params)

    out = jax.block_until_ready(decoder_layers(x, wslab, bslab))
    ref = jax.block_until_ready(reference(x, params))

    assert out.shape == (B, S, H)
    assert jnp.allclose(out, ref, atol=1e-4, rtol=1e-4), float(
        jnp.max(jnp.abs(out - ref)))
    print("KERNEL_OK")
</pallas_src>

<mosaic_0001>
module attributes {stable_mosaic.version = 11 : i64} {
  func.func @decoder_kernel(%arg0: memref<16x32xf32, #tpu.memory_space<vmem>>, %arg1: memref<32x768xf32, #tpu.memory_space<vmem>>, %arg2: memref<8x128xf32, #tpu.memory_space<vmem>>, %arg3: memref<16x32xf32, #tpu.memory_space<vmem>>) attributes {dimension_semantics = [], scalar_prefetch = 0 : i64, scratch_operands = 0 : i64, tpu.core_type = #tpu.core_type<tc>} {
    %c0 = arith.constant 0 : index
    %c0_0 = arith.constant 0 : index
    %0 = vector.load %arg0[%c0, %c0_0] : memref<16x32xf32, #tpu.memory_space<vmem>>, vector<16x32xf32>
    %c0_1 = arith.constant 0 : index
    %c0_2 = arith.constant 0 : index
    %1 = vector.load %arg1[%c0_1, %c0_2] : memref<32x768xf32, #tpu.memory_space<vmem>>, vector<32x768xf32>
    %c0_3 = arith.constant 0 : index
    %c0_4 = arith.constant 0 : index
    %2 = vector.load %arg2[%c0_3, %c0_4] : memref<8x128xf32, #tpu.memory_space<vmem>>, vector<8x128xf32>
    %3 = vector.extract_strided_slice %2 {offsets = [6, 0], sizes = [1, 32], strides = [1, 1]} : vector<8x128xf32> to vector<1x32xf32>
    %4 = vector.shape_cast %3 : vector<1x32xf32> to vector<1x32xf32>
    %5 = vector.broadcast %4 : vector<1x32xf32> to vector<16x32xf32>
    %6 = vector.extract_strided_slice %2 {offsets = [7, 0], sizes = [1, 32], strides = [1, 1]} : vector<8x128xf32> to vector<1x32xf32>
    %7 = vector.shape_cast %6 : vector<1x32xf32> to vector<1x32xf32>
    %8 = vector.broadcast %7 : vector<1x32xf32> to vector<16x32xf32>
    %9 = tpu.iota {dimensions = array<i32: 0>} : vector<64x16xi32>
    %c15_i32 = arith.constant 15 : i32
    %10 = vector.broadcast %c15_i32 : i32 to vector<64x16xi32>
    %11 = arith.andi %9, %10 : vector<64x16xi32>
    %12 = tpu.iota {dimensions = array<i32: 1>} : vector<64x16xi32>
    %c3_i32 = arith.constant 3 : i32
    %13 = vector.broadcast %c3_i32 : i32 to vector<64x16xi32>
    %14 = arith.shrsi %11, %13 : vector<64x16xi32>
    %c3_i32_5 = arith.constant 3 : i32
    %15 = vector.broadcast %c3_i32_5 : i32 to vector<64x16xi32>
    %16 = arith.shrsi %12, %15 : vector<64x16xi32>
    %17 = arith.cmpi eq, %14, %16 : vector<64x16xi32>
    %18 = arith.cmpi sge, %11, %12 : vector<64x16xi32>
    %19 = arith.andi %17, %18 : vector<64x16xi1>
    %cst = arith.constant 0.000000e+00 : f32
    %cst_6 = arith.constant -1.000000e+30 : f32
    %20 = vector.broadcast %cst : f32 to vector<64x16xf32>
    %21 = vector.broadcast %cst_6 : f32 to vector<64x16xf32>
    %22 = arith.select %19, %20, %21 : vector<64x16xi1>, vector<64x16xf32>
    %cst_7 = arith.constant 0.000000e+00 : f32
    %cst_8 = arith.constant -1.000000e+30 : f32
    %23 = vector.broadcast %cst_7 : f32 to vector<64x16xf32>
    %24 = vector.broadcast %cst_8 : f32 to vector<64x16xf32>
    %25 = arith.select %17, %23, %24 : vector<64x16xi1>, vector<64x16xf32>
    %cst_9 = arith.constant dense<0.000000e+00> : vector<16xf32>
    %26 = vector.multi_reduction <add>, %0, %cst_9 [1] : vector<16x32xf32> to vector<16xf32>
    %27 = vector.shape_cast %26 : vector<16xf32> to vector<16x1xf32>
    %cst_10 = arith.constant 3.200000e+01 : f32
    %28 = vector.broadcast %cst_10 : f32 to vector<16x1xf32>
    %29 = arith.divf %27, %28 : vector<16x1xf32>
    %30 = vector.broadcast %29 : vector<16x1xf32> to vector<16x32xf32>
    %31 = arith.subf %0, %30 : vector<16x32xf32>
    %32 = arith.mulf %31, %31 : vector<16x32xf32>
    %cst_11 = arith.constant dense<0.000000e+00> : vector<16xf32>
    %33 = vector.multi_reduction <add>, %32, %cst_11 [1] : vector<16x32xf32> to vector<16xf32>
    %34 = vector.shape_cast %33 : vector<16xf32> to vector<16x1xf32>
    %cst_12 = arith.constant 3.200000e+01 : f32
    %35 = vector.broadcast %cst_12 : f32 to vector<16x1xf32>
    %36 = arith.divf %34, %35 : vector<16x1xf32>
    %37 = vector.broadcast %29 : vector<16x1xf32> to vector<16x32xf32>
    %38 = arith.subf %0, %37 : vector<16x32xf32>
    %cst_13 = arith.constant 9.99999974E-6 : f32
    %39 = vector.broadcast %cst_13 : f32 to vector<16x1xf32>
    %40 = arith.addf %36, %39 : vector<16x1xf32>
    %41 = math.rsqrt %40 : vector<16x1xf32>
    %42 = vector.broadcast %41 : vector<16x1xf32> to vector<16x32xf32>
    %43 = arith.mulf %38, %42 : vector<16x32xf32>
    %44 = arith.mulf %43, %5 : vector<16x32xf32>
    %45 = arith.addf %44, %8 : vector<16x32xf32>
    %46 = vector.extract_strided_slice %1 {offsets = [0, 0], sizes = [32, 96], strides = [1, 1]} : vector<32x768xf32> to vector<32x96xf32>
    %cst_14 = arith.constant dense<0.000000e+00> : vector<16x96xf32>
    %47 = tpu.matmul %45, %46, %cst_14 {dimension_numbers = #tpu.dot_dimension_numbers<[1], [0], [0], [1], [0, 0, 1, 1], [], []>} : vector<16x32xf32>, vector<32x96xf32>, vector<16x96xf32> -> vector<16x96xf32>
    %48 = vector.extract_strided_slice %2 {offsets = [0, 0], sizes = [1, 96], strides = [1, 1]} : vector<8x128xf32> to vector<1x96xf32>
    %49 = vector.broadcast %48 : vector<1x96xf32> to vector<16x96xf32>
    %50 = arith.addf %47, %49 : vector<16x96xf32>
    %51 = vector.extract_strided_slice %50 {offsets = [0, 0], sizes = [16, 8], strides = [1, 1]} : vector<16x96xf32> to vector<16x8xf32>
    %52 = vector.extract_strided_slice %50 {offsets = [0, 32], sizes = [16, 8], strides = [1, 1]} : vector<16x96xf32> to vector<16x8xf32>
    %cst_15 = arith.constant dense<0.000000e+00> : vector<16x16xf32>
    %53 = tpu.matmul %51, %52, %cst_15 {dimension_numbers = #tpu.dot_dimension_numbers<[1], [1], [0], [0], [0, 0, 1, 0], [], []>} : vector<16x8xf32>, vector<16x8xf32>, vector<16x16xf32> -> vector<16x16xf32>
    %54 = vector.extract_strided_slice %50 {offsets = [0, 8], sizes = [16, 8], strides = [1, 1]} : vector<16x96xf32> to vector<16x8xf32>
    %55 = vector.extract_strided_slice %50 {offsets = [0, 40], sizes = [16, 8], strides = [1, 1]} : vector<16x96xf32> to vector<16x8xf32>
    %cst_16 = arith.constant dense<0.000000e+00> : vector<16x16xf32>
    %56 = tpu.matmul %54, %55, %cst_16 {dimension_numbers = #tpu.dot_dimension_numbers<[1], [1], [0], [0], [0, 0, 1, 0], [], []>} : vector<16x8xf32>, vector<16x8xf32>, vector<16x16xf32> -> vector<16x16xf32>
    %57 = vector.extract_strided_slice %50 {offsets = [0, 16], sizes = [16, 8], strides = [1, 1]} : vector<16x96xf32> to vector<16x8xf32>
    %58 = vector.extract_strided_slice %50 {offsets = [0, 48], sizes = [16, 8], strides = [1, 1]} : vector<16x96xf32> to vector<16x8xf32>
    %cst_17 = arith.constant dense<0.000000e+00> : vector<16x16xf32>
    %59 = tpu.matmul %57, %58, %cst_17 {dimension_numbers = #tpu.dot_dimension_numbers<[1], [1], [0], [0], [0, 0, 1, 0], [], []>} : vector<16x8xf32>, vector<16x8xf32>, vector<16x16xf32> -> vector<16x16xf32>
    %60 = vector.extract_strided_slice %50 {offsets = [0, 24], sizes = [16, 8], strides = [1, 1]} : vector<16x96xf32> to vector<16x8xf32>
    %61 = vector.extract_strided_slice %50 {offsets = [0, 56], sizes = [16, 8], strides = [1, 1]} : vector<16x96xf32> to vector<16x8xf32>
    %cst_18 = arith.constant dense<0.000000e+00> : vector<16x16xf32>
    %62 = tpu.matmul %60, %61, %cst_18 {dimension_numbers = #tpu.dot_dimension_numbers<[1], [1], [0], [0], [0, 0, 1, 0], [], []>} : vector<16x8xf32>, vector<16x8xf32>, vector<16x16xf32> -> vector<16x16xf32>
    %63 = tpu.concatenate %53, %56, %59, %62 in 0 : vector<16x16xf32>, vector<16x16xf32>, vector<16x16xf32>, vector<16x16xf32> -> vector<64x16xf32>
    %64 = arith.addf %63, %22 : vector<64x16xf32>
    %cst_19 = arith.constant dense<0xFF800000> : vector<64xf32>
    %65 = vector.multi_reduction <maximumf>, %64, %cst_19 [1] : vector<64x16xf32> to vector<64xf32>
    %66 = vector.shape_cast %65 : vector<64xf32> to vector<64x1xf32>
    %67 = vector.broadcast %66 : vector<64x1xf32> to vector<64x16xf32>
    %68 = arith.subf %64, %67 : vector<64x16xf32>
    %69 = math.exp %68 : vector<64x16xf32>
    %cst_20 = arith.constant dense<0.000000e+00> : vector<64xf32>
    %70 = vector.multi_reduction <add>, %69, %cst_20 [1] : vector<64x16xf32> to vector<64xf32>
    %71 = vector.shape_cast %70 : vector<64xf32> to vector<64x1xf32>
    %72 = tpu.reciprocal %71 : vector<64x1xf32> -> vector<64x1xf32>
    %73 = vector.broadcast %72 : vector<64x1xf32> to vector<64x16xf32>
    %74 = arith.mulf %69, %73 : vector<64x16xf32>
    %75 = vector.extract_strided_slice %1 {offsets = [0, 256], sizes = [32, 32], strides = [1, 1]} : vector<32x768xf32> to vector<32x32xf32>
    %76 = vector.extract_strided_slice %2 {offsets = [2, 0], sizes = [1, 32], strides = [1, 1]} : vector<8x128xf32> to vector<1x32xf32>
    %77 = vector.shape_cast %76 : vector<1x32xf32> to vector<1x32xf32>
    %78 = vector.broadcast %77 : vector<1x32xf32> to vector<16x32xf32>
    %79 = vector.extract_strided_slice %50 {offsets = [0, 64], sizes = [16, 8], strides = [1, 1]} : vector<16x96xf32> to vector<16x8xf32>
    %80 = vector.extract_strided_slice %74 {offsets = [0, 0], sizes = [16, 16], strides = [1, 1]} : vector<64x16xf32> to vector<16x16xf32>
    %cst_21 = arith.constant dense<0.000000e+00> : vector<16x8xf32>
    %81 = tpu.matmul %80, %79, %cst_21 {dimension_numbers = #tpu.dot_dimension_numbers<[1], [0], [0], [1], [0, 0, 1, 1], [], []>} : vector<16x16xf32>, vector<16x8xf32>, vector<16x8xf32> -> vector<16x8xf32>
    %82 = vector.extract_strided_slice %75 {offsets = [0, 0], sizes = [8, 32], strides = [1, 1]} : vector<32x32xf32> to vector<8x32xf32>
    %cst_22 = arith.constant dense<0.000000e+00> : vector<16x32xf32>
    %83 = tpu.matmul %81, %82, %cst_22 {dimension_numbers = #tpu.dot_dimension_numbers<[1], [0], [0], [1], [0, 0, 1, 1], [], []>} : vector<16x8xf32>, vector<8x32xf32>, vector<16x32xf32> -> vector<16x32xf32>
    %84 = arith.addf %78, %83 : vector<16x32xf32>
    %85 = vector.extract_strided_slice %50 {offsets = [0, 72], sizes = [16, 8], strides = [1, 1]} : vector<16x96xf32> to vector<16x8xf32>
    %86 = vector.extract_strided_slice %74 {offsets = [16, 0], sizes = [16, 16], strides = [1, 1]} : vector<64x16xf32> to vector<16x16xf32>
    %cst_23 = arith.constant dense<0.000000e+00> : vector<16x8xf32>
    %87 = tpu.matmul %86, %85, %cst_23 {dimension_numbers = #tpu.dot_dimension_numbers<[1], [0], [0], [1], [0, 0, 1, 1], [], []>} : vector<16x16xf32>, vector<16x8xf32>, vector<16x8xf32> -> vector<16x8xf32>
    %88 = vector.extract_strided_slice %75 {offsets = [8, 0], sizes = [8, 32], strides = [1, 1]} : vector<32x32xf32> to vector<8x32xf32>
    %cst_24 = arith.constant dense<0.000000e+00> : vector<16x32xf32>
    %89 = tpu.matmul %87, %88, %cst_24 {dimension_numbers = #tpu.dot_dimension_numbers<[1], [0], [0], [1], [0, 0, 1, 1], [], []>} : vector<16x8xf32>, vector<8x32xf32>, vector<16x32xf32> -> vector<16x32xf32>
    %90 = arith.addf %84, %89 : vector<16x32xf32>
    %91 = vector.extract_strided_slice %50 {offsets = [0, 80], sizes = [16, 8], strides = [1, 1]} : vector<16x96xf32> to vector<16x8xf32>
    %92 = vector.extract_strided_slice %74 {offsets = [32, 0], sizes = [16, 16], strides = [1, 1]} : vector<64x16xf32> to vector<16x16xf32>
    %cst_25 = arith.constant dense<0.000000e+00> : vector<16x8xf32>
    %93 = tpu.matmul %92, %91, %cst_25 {dimension_numbers = #tpu.dot_dimension_numbers<[1], [0], [0], [1], [0, 0, 1, 1], [], []>} : vector<16x16xf32>, vector<16x8xf32>, vector<16x8xf32> -> vector<16x8xf32>
    %94 = vector.extract_strided_slice %75 {offsets = [16, 0], sizes = [8, 32], strides = [1, 1]} : vector<32x32xf32> to vector<8x32xf32>
    %cst_26 = arith.constant dense<0.000000e+00> : vector<16x32xf32>
    %95 = tpu.matmul %93, %94, %cst_26 {dimension_numbers = #tpu.dot_dimension_numbers<[1], [0], [0], [1], [0, 0, 1, 1], [], []>} : vector<16x8xf32>, vector<8x32xf32>, vector<16x32xf32> -> vector<16x32xf32>
    %96 = arith.addf %90, %95 : vector<16x32xf32>
    %97 = vector.extract_strided_slice %50 {offsets = [0, 88], sizes = [16, 8], strides = [1, 1]} : vector<16x96xf32> to vector<16x8xf32>
    %98 = vector.extract_strided_slice %74 {offsets = [48, 0], sizes = [16, 16], strides = [1, 1]} : vector<64x16xf32> to vector<16x16xf32>
    %cst_27 = arith.constant dense<0.000000e+00> : vector<16x8xf32>
    %99 = tpu.matmul %98, %97, %cst_27 {dimension_numbers = #tpu.dot_dimension_numbers<[1], [0], [0], [1], [0, 0, 1, 1], [], []>} : vector<16x16xf32>, vector<16x8xf32>, vector<16x8xf32> -> vector<16x8xf32>
    %100 = vector.extract_strided_slice %75 {offsets = [24, 0], sizes = [8, 32], strides = [1, 1]} : vector<32x32xf32> to vector<8x32xf32>
    %cst_28 = arith.constant dense<0.000000e+00> : vector<16x32xf32>
    %101 = tpu.matmul %99, %100, %cst_28 {dimension_numbers = #tpu.dot_dimension_numbers<[1], [0], [0], [1], [0, 0, 1, 1], [], []>} : vector<16x8xf32>, vector<8x32xf32>, vector<16x32xf32> -> vector<16x32xf32>
    %102 = arith.addf %96, %101 : vector<16x32xf32>
    %103 = arith.addf %0, %102 : vector<16x32xf32>
    %cst_29 = arith.constant dense<0.000000e+00> : vector<16xf32>
    %104 = vector.multi_reduction <add>, %103, %cst_29 [1] : vector<16x32xf32> to vector<16xf32>
    %105 = vector.shape_cast %104 : vector<16xf32> to vector<16x1xf32>
    %cst_30 = arith.constant 3.200000e+01 : f32
    %106 = vector.broadcast %cst_30 : f32 to vector<16x1xf32>
    %107 = arith.divf %105, %106 : vector<16x1xf32>
    %108 = vector.broadcast %107 : vector<16x1xf32> to vector<16x32xf32>
    %109 = arith.subf %103, %108 : vector<16x32xf32>
    %110 = arith.mulf %109, %109 : vector<16x32xf32>
    %cst_31 = arith.constant dense<0.000000e+00> : vector<16xf32>
    %111 = vector.multi_reduction <add>, %110, %cst_31 [1] : vector<16x32xf32> to vector<16xf32>
    %112 = vector.shape_cast %111 : vector<16xf32> to vector<16x1xf32>
    %cst_32 = arith.constant 3.200000e+01 : f32
    %113 = vector.broadcast %cst_32 : f32 to vector<16x1xf32>
    %114 = arith.divf %112, %113 : vector<16x1xf32>
    %115 = vector.broadcast %107 : vector<16x1xf32> to vector<16x32xf32>
    %116 = arith.subf %103, %115 : vector<16x32xf32>
    %cst_33 = arith.constant 9.99999974E-6 : f32
    %117 = vector.broadcast %cst_33 : f32 to vector<16x1xf32>
    %118 = arith.addf %114, %117 : vector<16x1xf32>
    %119 = math.rsqrt %118 : vector<16x1xf32>
    %120 = vector.broadcast %119 : vector<16x1xf32> to vector<16x32xf32>
    %121 = arith.mulf %116, %120 : vector<16x32xf32>
    %122 = arith.mulf %121, %5 : vector<16x32xf32>
    %123 = arith.addf %122, %8 : vector<16x32xf32>
    %124 = vector.extract_strided_slice %1 {offsets = [0, 128], sizes = [32, 96], strides = [1, 1]} : vector<32x768xf32> to vector<32x96xf32>
    %cst_34 = arith.constant dense<0.000000e+00> : vector<16x96xf32>
    %125 = tpu.matmul %123, %124, %cst_34 {dimension_numbers = #tpu.dot_dimension_numbers<[1], [0], [0], [1], [0, 0, 1, 1], [], []>} : vector<16x32xf32>, vector<32x96xf32>, vector<16x96xf32> -> vector<16x96xf32>
    %126 = vector.extract_strided_slice %2 {offsets = [1, 0], sizes = [1, 96], strides = [1, 1]} : vector<8x128xf32> to vector<1x96xf32>
    %127 = vector.broadcast %126 : vector<1x96xf32> to vector<16x96xf32>
    %128 = arith.addf %125, %127 : vector<16x96xf32>
    %129 = vector.extract_strided_slice %128 {offsets = [0, 0], sizes = [16, 8], strides = [1, 1]} : vector<16x96xf32> to vector<16x8xf32>
    %130 = vector.extract_strided_slice %128 {offsets = [0, 32], sizes = [16, 8], strides = [1, 1]} : vector<16x96xf32> to vector<16x8xf32>
    %cst_35 = arith.constant dense<0.000000e+00> : vector<16x16xf32>
    %131 = tpu.matmul %129, %130, %cst_35 {dimension_numbers = #tpu.dot_dimension_numbers<[1], [1], [0], [0], [0, 0, 1, 0], [], []>} : vector<16x8xf32>, vector<16x8xf32>, vector<16x16xf32> -> vector<16x16xf32>
    %132 = vector.extract_strided_slice %128 {offsets = [0, 8], sizes = [16, 8], strides = [1, 1]} : vector<16x96xf32> to vector<16x8xf32>
    %133 = vector.extract_strided_slice %128 {offsets = [0, 40], sizes = [16, 8], strides = [1, 1]} : vector<16x96xf32> to vector<16x8xf32>
    %cst_36 = arith.constant dense<0.000000e+00> : vector<16x16xf32>
    %134 = tpu.matmul %132, %133, %cst_36 {dimension_numbers = #tpu.dot_dimension_numbers<[1], [1], [0], [0], [0, 0, 1, 0], [], []>} : vector<16x8xf32>, vector<16x8xf32>, vector<16x16xf32> -> vector<16x16xf32>
    %135 = vector.extract_strided_slice %128 {offsets = [0, 16], sizes = [16, 8], strides = [1, 1]} : vector<16x96xf32> to vector<16x8xf32>
    %136 = vector.extract_strided_slice %128 {offsets = [0, 48], sizes = [16, 8], strides = [1, 1]} : vector<16x96xf32> to vector<16x8xf32>
    %cst_37 = arith.constant dense<0.000000e+00> : vector<16x16xf32>
    %137 = tpu.matmul %135, %136, %cst_37 {dimension_numbers = #tpu.dot_dimension_numbers<[1], [1], [0], [0], [0, 0, 1, 0], [], []>} : vector<16x8xf32>, vector<16x8xf32>, vector<16x16xf32> -> vector<16x16xf32>
    %138 = vector.extract_strided_slice %128 {offsets = [0, 24], sizes = [16, 8], strides = [1, 1]} : vector<16x96xf32> to vector<16x8xf32>
    %139 = vector.extract_strided_slice %128 {offsets = [0, 56], sizes = [16, 8], strides = [1, 1]} : vector<16x96xf32> to vector<16x8xf32>
    %cst_38 = arith.constant dense<0.000000e+00> : vector<16x16xf32>
    %140 = tpu.matmul %138, %139, %cst_38 {dimension_numbers = #tpu.dot_dimension_numbers<[1], [1], [0], [0], [0, 0, 1, 0], [], []>} : vector<16x8xf32>, vector<16x8xf32>, vector<16x16xf32> -> vector<16x16xf32>
    %141 = tpu.concatenate %131, %134, %137, %140 in 0 : vector<16x16xf32>, vector<16x16xf32>, vector<16x16xf32>, vector<16x16xf32> -> vector<64x16xf32>
    %142 = arith.addf %141, %25 : vector<64x16xf32>
    %cst_39 = arith.constant dense<0xFF800000> : vector<64xf32>
    %143 = vector.multi_reduction <maximumf>, %142, %cst_39 [1] : vector<64x16xf32> to vector<64xf32>
    %144 = vector.shape_cast %143 : vector<64xf32> to vector<64x1xf32>
    %145 = vector.broadcast %144 : vector<64x1xf32> to vector<64x16xf32>
    %146 = arith.subf %142, %145 : vector<64x16xf32>
    %147 = math.exp %146 : vector<64x16xf32>
    %cst_40 = arith.constant dense<0.000000e+00> : vector<64xf32>
    %148 = vector.multi_reduction <add>, %147, %cst_40 [1] : vector<64x16xf32> to vector<64xf32>
    %149 = vector.shape_cast %148 : vector<64xf32> to vector<64x1xf32>
    %150 = tpu.reciprocal %149 : vector<64x1xf32> -> vector<64x1xf32>
    %151 = vector.broadcast %150 : vector<64x1xf32> to vector<64x16xf32>
    %152 = arith.mulf %147, %151 : vector<64x16xf32>
    %153 = vector.extract_strided_slice %1 {offsets = [0, 384], sizes = [32, 32], strides = [1, 1]} : vector<32x768xf32> to vector<32x32xf32>
    %154 = vector.extract_strided_slice %2 {offsets = [3, 0], sizes = [1, 32], strides = [1, 1]} : vector<8x128xf32> to vector<1x32xf32>
    %155 = vector.shape_cast %154 : vector<1x32xf32> to vector<1x32xf32>
    %156 = vector.broadcast %155 : vector<1x32xf32> to vector<16x32xf32>
    %157 = vector.extract_strided_slice %128 {offsets = [0, 64], sizes = [16, 8], strides = [1, 1]} : vector<16x96xf32> to vector<16x8xf32>
    %158 = vector.extract_strided_slice %152 {offsets = [0, 0], sizes = [16, 16], strides = [1, 1]} : vector<64x16xf32> to vector<16x16xf32>
    %cst_41 = arith.constant dense<0.000000e+00> : vector<16x8xf32>
    %159 = tpu.matmul %158, %157, %cst_41 {dimension_numbers = #tpu.dot_dimension_numbers<[1], [0], [0], [1], [0, 0, 1, 1], [], []>} : vector<16x16xf32>, vector<16x8xf32>, vector<16x8xf32> -> vector<16x8xf32>
    %160 = vector.extract_strided_slice %153 {offsets = [0, 0], sizes = [8, 32], strides = [1, 1]} : vector<32x32xf32> to vector<8x32xf32>
    %cst_42 = arith.constant dense<0.000000e+00> : vector<16x32xf32>
    %161 = tpu.matmul %159, %160, %cst_42 {dimension_numbers = #tpu.dot_dimension_numbers<[1], [0], [0], [1], [0, 0, 1, 1], [], []>} : vector<16x8xf32>, vector<8x32xf32>, vector<16x32xf32> -> vector<16x32xf32>
    %162 = arith.addf %156, %161 : vector<16x32xf32>
    %163 = vector.extract_strided_slice %128 {offsets = [0, 72], sizes = [16, 8], strides = [1, 1]} : vector<16x96xf32> to vector<16x8xf32>
    %164 = vector.extract_strided_slice %152 {offsets = [16, 0], sizes = [16, 16], strides = [1, 1]} : vector<64x16xf32> to vector<16x16xf32>
    %cst_43 = arith.constant dense<0.000000e+00> : vector<16x8xf32>
    %165 = tpu.matmul %164, %163, %cst_43 {dimension_numbers = #tpu.dot_dimension_numbers<[1], [0], [0], [1], [0, 0, 1, 1], [], []>} : vector<16x16xf32>, vector<16x8xf32>, vector<16x8xf32> -> vector<16x8xf32>
    %166 = vector.extract_strided_slice %153 {offsets = [8, 0], sizes = [8, 32], strides = [1, 1]} : vector<32x32xf32> to vector<8x32xf32>
    %cst_44 = arith.constant dense<0.000000e+00> : vector<16x32xf32>
    %167 = tpu.matmul %165, %166, %cst_44 {dimension_numbers = #tpu.dot_dimension_numbers<[1], [0], [0], [1], [0, 0, 1, 1], [], []>} : vector<16x8xf32>, vector<8x32xf32>, vector<16x32xf32> -> vector<16x32xf32>
    %168 = arith.addf %162, %167 : vector<16x32xf32>
    %169 = vector.extract_strided_slice %128 {offsets = [0, 80], sizes = [16, 8], strides = [1, 1]} : vector<16x96xf32> to vector<16x8xf32>
    %170 = vector.extract_strided_slice %152 {offsets = [32, 0], sizes = [16, 16], strides = [1, 1]} : vector<64x16xf32> to vector<16x16xf32>
    %cst_45 = arith.constant dense<0.000000e+00> : vector<16x8xf32>
    %171 = tpu.matmul %170, %169, %cst_45 {dimension_numbers = #tpu.dot_dimension_numbers<[1], [0], [0], [1], [0, 0, 1, 1], [], []>} : vector<16x16xf32>, vector<16x8xf32>, vector<16x8xf32> -> vector<16x8xf32>
    %172 = vector.extract_strided_slice %153 {offsets = [16, 0], sizes = [8, 32], strides = [1, 1]} : vector<32x32xf32> to vector<8x32xf32>
    %cst_46 = arith.constant dense<0.000000e+00> : vector<16x32xf32>
    %173 = tpu.matmul %171, %172, %cst_46 {dimension_numbers = #tpu.dot_dimension_numbers<[1], [0], [0], [1], [0, 0, 1, 1], [], []>} : vector<16x8xf32>, vector<8x32xf32>, vector<16x32xf32> -> vector<16x32xf32>
    %174 = arith.addf %168, %173 : vector<16x32xf32>
    %175 = vector.extract_strided_slice %128 {offsets = [0, 88], sizes = [16, 8], strides = [1, 1]} : vector<16x96xf32> to vector<16x8xf32>
    %176 = vector.extract_strided_slice %152 {offsets = [48, 0], sizes = [16, 16], strides = [1, 1]} : vector<64x16xf32> to vector<16x16xf32>
    %cst_47 = arith.constant dense<0.000000e+00> : vector<16x8xf32>
    %177 = tpu.matmul %176, %175, %cst_47 {dimension_numbers = #tpu.dot_dimension_numbers<[1], [0], [0], [1], [0, 0, 1, 1], [], []>} : vector<16x16xf32>, vector<16x8xf32>, vector<16x8xf32> -> vector<16x8xf32>
    %178 = vector.extract_strided_slice %153 {offsets = [24, 0], sizes = [8, 32], strides = [1, 1]} : vector<32x32xf32> to vector<8x32xf32>
    %cst_48 = arith.constant dense<0.000000e+00> : vector<16x32xf32>
    %179 = tpu.matmul %177, %178, %cst_48 {dimension_numbers = #tpu.dot_dimension_numbers<[1], [0], [0], [1], [0, 0, 1, 1], [], []>} : vector<16x8xf32>, vector<8x32xf32>, vector<16x32xf32> -> vector<16x32xf32>
    %180 = arith.addf %174, %179 : vector<16x32xf32>
    %181 = arith.addf %103, %180 : vector<16x32xf32>
    %cst_49 = arith.constant dense<0.000000e+00> : vector<16xf32>
    %182 = vector.multi_reduction <add>, %181, %cst_49 [1] : vector<16x32xf32> to vector<16xf32>
    %183 = vector.shape_cast %182 : vector<16xf32> to vector<16x1xf32>
    %cst_50 = arith.constant 3.200000e+01 : f32
    %184 = vector.broadcast %cst_50 : f32 to vector<16x1xf32>
    %185 = arith.divf %183, %184 : vector<16x1xf32>
    %186 = vector.broadcast %185 : vector<16x1xf32> to vector<16x32xf32>
    %187 = arith.subf %181, %186 : vector<16x32xf32>
    %188 = arith.mulf %187, %187 : vector<16x32xf32>
    %cst_51 = arith.constant dense<0.000000e+00> : vector<16xf32>
    %189 = vector.multi_reduction <add>, %188, %cst_51 [1] : vector<16x32xf32> to vector<16xf32>
    %190 = vector.shape_cast %189 : vector<16xf32> to vector<16x1xf32>
    %cst_52 = arith.constant 3.200000e+01 : f32
    %191 = vector.broadcast %cst_52 : f32 to vector<16x1xf32>
    %192 = arith.divf %190, %191 : vector<16x1xf32>
    %193 = vector.broadcast %185 : vector<16x1xf32> to vector<16x32xf32>
    %194 = arith.subf %181, %193 : vector<16x32xf32>
    %cst_53 = arith.constant 9.99999974E-6 : f32
    %195 = vector.broadcast %cst_53 : f32 to vector<16x1xf32>
    %196 = arith.addf %192, %195 : vector<16x1xf32>
    %197 = math.rsqrt %196 : vector<16x1xf32>
    %198 = vector.broadcast %197 : vector<16x1xf32> to vector<16x32xf32>
    %199 = arith.mulf %194, %198 : vector<16x32xf32>
    %200 = arith.mulf %199, %5 : vector<16x32xf32>
    %201 = arith.addf %200, %8 : vector<16x32xf32>
    %202 = vector.extract_strided_slice %1 {offsets = [0, 512], sizes = [32, 32], strides = [1, 1]} : vector<32x768xf32> to vector<32x32xf32>
    %cst_54 = arith.constant dense<0.000000e+00> : vector<16x32xf32>
    %203 = tpu.matmul %201, %202, %cst_54 {dimension_numbers = #tpu.dot_dimension_numbers<[1], [0], [0], [1], [0, 0, 1, 1], [], []>} : vector<16x32xf32>, vector<32x32xf32>, vector<16x32xf32> -> vector<16x32xf32>
    %204 = vector.extract_strided_slice %2 {offsets = [4, 0], sizes = [1, 32], strides = [1, 1]} : vector<8x128xf32> to vector<1x32xf32>
    %205 = vector.broadcast %204 : vector<1x32xf32> to vector<16x32xf32>
    %206 = arith.addf %203, %205 : vector<16x32xf32>
    %cst_55 = arith.constant 5.000000e-01 : f32
    %207 = vector.broadcast %cst_55 : f32 to vector<16x32xf32>
    %208 = arith.mulf %207, %206 : vector<16x32xf32>
    %cst_56 = arith.constant 4.471500e-02 : f32
    %209 = vector.broadcast %cst_56 : f32 to vector<16x32xf32>
    %210 = arith.mulf %209, %206 : vector<16x32xf32>
    %211 = arith.mulf %210, %206 : vector<16x32xf32>
    %212 = arith.mulf %211, %206 : vector<16x32xf32>
    %213 = arith.addf %206, %212 : vector<16x32xf32>
    %cst_57 = arith.constant 0.797884583 : f32
    %214 = vector.broadcast %cst_57 : f32 to vector<16x32xf32>
    %215 = arith.mulf %214, %213 : vector<16x32xf32>
    %216 = math.tanh %215 : vector<16x32xf32>
    %cst_58 = arith.constant 1.000000e+00 : f32
    %217 = vector.broadcast %cst_58 : f32 to vector<16x32xf32>
    %218 = arith.addf %217, %216 : vector<16x32xf32>
    %219 = arith.mulf %208, %218 : vector<16x32xf32>
    %220 = vector.extract_strided_slice %1 {offsets = [0, 640], sizes = [32, 32], strides = [1, 1]} : vector<32x768xf32> to vector<32x32xf32>
    %cst_59 = arith.constant dense<0.000000e+00> : vector<16x32xf32>
    %221 = tpu.matmul %219, %220, %cst_59 {dimension_numbers = #tpu.dot_dimension_numbers<[1], [0], [0], [1], [0, 0, 1, 1], [], []>} : vector<16x32xf32>, vector<32x32xf32>, vector<16x32xf32> -> vector<16x32xf32>
    %222 = vector.extract_strided_slice %2 {offsets = [5, 0], sizes = [1, 32], strides = [1, 1]} : vector<8x128xf32> to vector<1x32xf32>
    %223 = vector.broadcast %222 : vector<1x32xf32> to vector<16x32xf32>
    %224 = arith.addf %221, %223 : vector<16x32xf32>
    %225 = arith.addf %181, %224 : vector<16x32xf32>
    %c0_60 = arith.constant 0 : index
    %c0_61 = arith.constant 0 : index
    %226 = vector.load %arg3[%c0_60, %c0_61] : memref<16x32xf32, #tpu.memory_space<vmem>>, vector<16x32xf32>
    tpu.vector_store %arg3[%c0_60, %c0_61], %225 {strides = array<i32>} : memref<16x32xf32, #tpu.memory_space<vmem>>, vector<16x32xf32>,
    return
  }
}

</mosaic_0001>

<bundles_post_ra>
// kernel: decoder_layers.1
= control target key start
LH: loop header
LB: loop body
LE: loop exit
PB: predicated region body
PF: predicated region fallthrough
CT: control target
= control target key end

     0   :  { %8 = vsyncpa [#allocation3], 0  ;;  %s3984_s0 = inlined_call_operand.hbm [shape: f32[16,32], index: 0, kind: input, shape index: {}]   ;;  %s3985_s1 = inlined_call_operand.hbm [shape: f32[32,768], index: 1, kind: input, shape index: {}]   ;;  %s3986_s2 = inlined_call_operand.hbm [shape: f32[8,128], index: 2, kind: input, shape index: {}]   ;;  %s3987_s3 = inlined_call_operand.hbm [shape: f32[16,32], index: 3, kind: output, shape index: {}]  }
   0x1   :  { %9 = vsyncpa [#allocation6], 0 }
   0x2   :  { %10 = vsyncpa [#allocation4], 0  ;;  %s3485_s12 = smov [#allocation5]  }
   0x3   :  { %s28_s13 = sshll.u32 %s3485_s12, 4  ;;  %s29_s13 = int_to_ptr.vmem [resolvable:$true] %s28_s13 }
   0x4   :  { %s3407_s14 = scalar_lea.vmem %s29_s13, 3072  ;;  %p3412_p1 = scmp.lt.s32.totalorder %s29_s13, %s29_s13 }
   0x5   :  { %p3408_p0 = scmp.ne.s32.totalorder %s29_s13, %s3407_s14  ;;  %p3413_p2 = scmp.lt.s32.totalorder %s3407_s14, %s3407_s14 }
   0x7   :  { %p3414_p3 = por %p3413_p2, %p3412_p1 }
   0x9   :  { %p3415_p4 = pnand %p3414_p3, %p3408_p0 }
   0xb   :  { %3418 = shalt.err (!%p3415_p4)
}
   0xc   :  { %s3486_s15 = smov 768   ;;  %s3487_s16 = smov 48  }
   0xd   :  { %34 = dma.hbm_to_vmem [thread:$0]  %s3985_s1, 3072, %s29_s13, [#allocation6], %s3486_s15, %s3486_s15, %s3487_s16  }
   0xe   :  { %s3488_s19 = smov [#allocation2]  }
   0xf   :  { %s16_s20 = sshll.u32 %s3488_s19, 4  ;;  %s17_s20 = int_to_ptr.vmem [resolvable:$true] %s16_s20 }
  0x10   :  { %s3427_s21 = scalar_lea.vmem %s17_s20, 256  ;;  %p3432_p6 = scmp.lt.s32.totalorder %s17_s20, %s17_s20 }
  0x11   :  { %p3428_p5 = scmp.ne.s32.totalorder %s17_s20, %s3427_s21  ;;  %p3433_p7 = scmp.lt.s32.totalorder %s3427_s21, %s3427_s21 }
  0x13   :  { %p3434_p8 = por %p3433_p7, %p3432_p6 }
  0x15   :  { %p3435_p9 = pnand %p3434_p8, %p3428_p5 }
  0x17   :  { %3438 = shalt.err (!%p3435_p9)
}
  0x18   :  { %s3489_s22 = smov 128   ;;  %s3490_s23 = smov 8  }
  0x19   :  { %22 = dma.hbm_to_vmem [thread:$0]  %s3984_s0, 256, %s17_s20, [#allocation3], %s3489_s22, %s3489_s22, %s3490_s23  }
  0x1a   :  { %s3491_s1 = smov [#allocation7]  }
  0x1b   :  { %s41_s26 = sshll.u32 %s3491_s1, 4  ;;  %s42_s26 = int_to_ptr.vmem [resolvable:$true] %s41_s26 }
  0x1c   :  { %s3447_s27 = scalar_lea.vmem %s42_s26, 128  ;;  %p3452_p11 = scmp.lt.s32.totalorder %s42_s26, %s42_s26 }
  0x1d   :  { %p3448_p10 = scmp.ne.s32.totalorder %s42_s26, %s3447_s27  ;;  %p3453_p12 = scmp.lt.s32.totalorder %s3447_s27, %s3447_s27 }
  0x1f   :  { %p3454_p13 = por %p3453_p12, %p3452_p11 }
  0x21   :  { %p3455_p0 = pnand %p3454_p13, %p3448_p10 }
  0x23   :  { %3458 = shalt.err (!%p3455_p0)
}
  0x24   :  { %44 = dma.hbm_to_vmem [thread:$0]  %s3986_s2, 128, %s42_s26, [#allocation6]  }
  0x25   :  { %3479 = dma.done.wait [#allocation3], 256  }
  0x26   :  { %3480 = vsyncadd [#allocation3], 4294967040 }
  0x27   :  { %3481 = dma.done.wait [#allocation6], 3200  }
  0x28   :  { %3482 = vsyncadd [#allocation6], 4294964096  ;;  %vm157_vm0 = vcmask 261120   ;;  %v3537_v0 = vld [vmem:[#allocation2] sm:$0xff]  ;;  %v3539_v1 = vld [vmem:[#allocation2 + $0x8] sm:$0xff]  ;;  %v81_v23 = vlaneseq  ;;  %vm280_vm1 = vcmask 64512  }
  0x29   :  { %v158_v2 = vsel %vm157_vm0, %v3537_v0, 0.0  ;;  %v161_v3 = vsel %vm157_vm0, %v3539_v1, 0.0  ;;  %v74_v14 = vld [vmem:[#allocation5 + $0x90] sm:$0xff]  ;;  %v68_v15 = vld [vmem:[#allocation5 + $0x60] sm:$0xff]  ;;  %s3492_s0 = smov 88   ;;  %s3493_s2 = smov 96  }
  0x2a   :  { %159 = vadd.xlane.f32.xlu0 %v158_v2  ;;  %3103 = vmatprep.subr.mxu0 %v74_v14  ;;  %v62_v16 = vld [vmem:[#allocation5 + $0x30] sm:$0xff]  ;;  %v56_v17 = vld [vmem:[#allocation5] sm:$0xff]  ;;  %v3550_v25 = vshrl.u32 %v81_v23, 7  ;;  %s3494_s30 = smov 80   ;;  %s3495_s4 = smov 120   ;;  %v3630_v61 = vand.u32 127, %v81_v23 }
  0x2b   :  { %3104 = vmatpush3.msra.mxu0 %v74_v14  ;;  %v3553_v27 = vld [vmem:[#allocation7] sm:$0xff]  ;;  %s3496_s5 = smov 72   ;;  %s3497_s6 = smov 112   ;;  %vm645_vm10 = vcmask 130048  }
  0x2c   :  { %3105 = vmatprep.subr.mxu0 %v68_v15  ;;  %v83_v26 = vsub.s32 6, %v3550_v25  ;;  %v87_v28 = vsub.s32 7, %v3550_v25  ;;  %v191_v39 = vsub.s32 0, %v3550_v25  ;;  %s3498_s7 = smov 104   ;;  %v91_v59 = vadd.s32 8, %v3550_v25  ;;  %s3500_s8 = smov 64  }
  0x2d   :  { %3106 = vmatpush3.msra.mxu0 %v68_v15  ;;  %v93_v62 = vadd.s32 24, %v3550_v25  ;;  %v3636_v2 = vshra.s32 %v3630_v61, 3  ;;  %s3501_s9 = smov 56   ;;  %s3502_s10 = smov 40  }
  0x2e   :  { %162 = vadd.xlane.f32.xlu0 %v161_v3  ;;  %3107 = vmatprep.subr.mxu0 %v62_v16  ;;  %v3557_v29 = vrot.slane %v3553_v27, %v83_v26  ;;  %v3560_v31 = vrot.slane %v3553_v27, %v87_v28  ;;  %v192_v40 = vrot.slane %v3553_v27, %v191_v39  ;;  %v99_v60 = vand.u32 15, %v91_v59  ;;  %s3503_s11 = smov [#allocation8]  }
  0x2f   :  { %3108 = vmatpush3.msra.mxu0 %v62_v16  ;;  %v101_v3 = vand.u32 15, %v93_v62  ;;  %s2906_s12 = sshll.u32 %s3503_s11, 4  ;;  %s2907_s12 = int_to_ptr.vmem [resolvable:$true] %s2906_s12 }
  0x30   :  { %3109 = vmatprep.subr.mxu0 %v56_v17  ;;  %v3633_v63 = vshra.s32 %v99_v60, 3  ;;  %vm126_vm3 = vcmp.ge.s32.totalorder %v99_v60, %v3630_v61  ;;  %s3459_s13 = scalar_lea.vmem %s2907_s12, 256  ;;  %p3464_p2 = scmp.lt.s32.totalorder %s2907_s12, %s2907_s12 }
  0x31   :  { %3110 = vmatpush3.msra.mxu0 %v56_v17  ;;  %vm128_vm6 = vcmp.ge.s32.totalorder %v101_v3, %v3630_v61  ;;  %v97_v17 = vadd.s32 56, %v3550_v25  ;;  %p3460_p1 = scmp.ne.s32.totalorder %s2907_s12, %s3459_s13  ;;  %p3465_p3 = scmp.lt.s32.totalorder %s3459_s13, %s3459_s13 }
  0x32   :  { %vm118_vm2 = vcmp.eq.s32.totalorder %v3633_v63, %v3636_v2 }
  0x33   :  { %vm134_vm4 = vmand %vm118_vm2, %vm126_vm3  ;;  %p3466_p4 = por %p3465_p3, %p3464_p2 }
  0x35   :  { %p3467_p5 = pnand %p3466_p4, %p3460_p1 }
  0xb3   :  { %v160_v4 = vpop.xlane.xlu0 %159 }
  0xb4   :  { %v165_v5 = vmul.f32 0.03125, %v160_v4  ;;  %v98_v4 = vand.u32 15, %v3550_v25 }
  0xb6   :  { %v167_v6 = vsub.f32 %v3537_v0, %v165_v5  ;;  %v92_v5 = vadd.s32 16, %v3550_v25  ;;  %vm125_vm8 = vcmp.ge.s32.totalorder %v98_v4, %v3630_v61 }
  0xb7   :  { %v163_v7 = vpop.xlane.xlu0 %162 }
  0xb8   :  { %v166_v8 = vmul.f32 0.03125, %v163_v7  ;;  %v169_v9 = vmul.f32 %v167_v6, %v167_v6  ;;  %v95_v7 = vadd.s32 40, %v3550_v25 }
  0xba   :  { %v168_v10 = vsub.f32 %v3539_v1, %v166_v8  ;;  %v171_v11 = vsel %vm157_vm0, %v169_v9, 0.0  ;;  %v3649_v8 = vshra.s32 %v98_v4, 3  ;;  %v100_v9 = vand.u32 15, %v92_v5 }
  0xbb   :  { %172 = vadd.xlane.f32.xlu1 %v171_v11  ;;  %v103_v11 = vand.u32 15, %v95_v7 }
  0xbc   :  { %v170_v12 = vmul.f32 %v168_v10, %v168_v10  ;;  %vm117_vm7 = vcmp.eq.s32.totalorder %v3649_v8, %v3636_v2  ;;  %v3662_v14 = vshra.s32 %v100_v9, 3  ;;  %vm127_vm13 = vcmp.ge.s32.totalorder %v100_v9, %v3630_v61 }
  0xbd   :  { %vm133_vm11 = vmand %vm117_vm7, %vm125_vm8  ;;  %vm130_vm15 = vcmp.ge.s32.totalorder %v103_v11, %v3630_v61 }
  0xbe   :  { %v174_v13 = vsel %vm157_vm0, %v170_v12, 0.0  ;;  %v3499_v12 = vmov -1e+30   ;;  %vm119_vm12 = vcmp.eq.s32.totalorder %v3662_v14, %v3636_v2 }
  0xbf   :  { %175 = vadd.xlane.f32.xlu1 %v174_v13  ;;  %v142_v13 = vsel %vm134_vm4, 0.0, %v3499_v12  ;;  %v141_v26 = vsel %vm133_vm11, 0.0, %v3499_v12  ;;  %vm135_vm3 = vmand %vm119_vm12, %vm127_vm13 }
 0x144   :  { %v173_v18 = vpop.xlane.xlu1 %172 }
 0x145   :  { %v177_v19 = vmul.f32 0.03125, %v173_v18 }
 0x147   :  { %v179_v20 = vadd.f32 1e-05, %v177_v19  ;;  %v3667_v19 = vshra.s32 %v103_v11, 3 }
 0x148   :  { %v176_v21 = vpop.xlane.xlu1 %175 }
 0x149   :  { %3318 = vrsqrt.f32 %v179_v20  ;;  %v178_v22 = vmul.f32 0.03125, %v176_v21  ;;  %v96_v21 = vadd.s32 48, %v3550_v25  ;;  %vm122_vm14 = vcmp.eq.s32.totalorder %v3667_v19, %v3636_v2 }
 0x14a   :  { %vm138_vm8 = vmand %vm122_vm14, %vm130_vm15 }
 0x14b   :  { %v180_v24 = vadd.f32 1e-05, %v178_v22 }
 0x14d   :  { %3320 = vrsqrt.f32 %v180_v24  ;;  %v105_v24 = vand.u32 15, %v97_v17 }
 0x14f   :  { %vm132_vm13 = vcmp.ge.s32.totalorder %v105_v24, %v3630_v61 }
 0x156   :  { %v3319_v30 = vpop.eup %3318 }
 0x157   :  { %v183_v32 = vmul.f32 %v3319_v30, %v167_v6  ;;  %v3643_v6 = vshra.s32 %v101_v3, 3 }
 0x159   :  { %v185_v33 = vmul.f32 %v183_v32, %v3557_v29  ;;  %vm120_vm5 = vcmp.eq.s32.totalorder %v3643_v6, %v3636_v2  ;;  %v154_v6 = vsel %vm122_vm14, 0.0, %v3499_v12 }
 0x15a   :  { %v3321_v34 = vpop.eup %3320  ;;  %vm136_vm9 = vmand %vm120_vm5, %vm128_vm6 }
 0x15b   :  { %v187_v35 = vadd.f32 %v185_v33, %v3560_v31  ;;  %v184_v36 = vmul.f32 %v3321_v34, %v168_v10  ;;  %v94_v10 = vadd.s32 32, %v3550_v25  ;;  %v144_v20 = vsel %vm136_vm9, 0.0, %v3499_v12 }
 0x15c   :  { %v104_v33 = vand.u32 15, %v96_v21 }
 0x15d   :  { %3111 = vmatprep.mubr.msk.f32.mxu0 %vm157_vm0, %v187_v35  ;;  %v186_v37 = vmul.f32 %v184_v36, %v3557_v29  ;;  %v102_v15 = vand.u32 15, %v94_v10  ;;  %v3695_v36 = vshra.s32 %v105_v24, 3 }
 0x15e   :  { %v3701_v39 = vshra.s32 %v104_v33, 3 }
 0x15f   :  { %v188_v38 = vadd.f32 %v186_v37, %v3560_v31  ;;  %v3679_v23 = vshra.s32 %v102_v15, 3  ;;  %vm129_vm6 = vcmp.ge.s32.totalorder %v102_v15, %v3630_v61  ;;  %v143_v37 = vsel %vm135_vm3, 0.0, %v3499_v12 }
 0x160   :  { %vm124_vm11 = vcmp.eq.s32.totalorder %v3695_v36, %v3636_v2  ;;  %vm123_vm15 = vcmp.eq.s32.totalorder %v3701_v39, %v3636_v2  ;;  %vm131_vm3 = vcmp.ge.s32.totalorder %v104_v33, %v3630_v61 }
 0x161   :  { %3112 = vmatmul.mubr.msk.f32.vlgmr.msra.gmra.mxu0 %vm157_vm0, %v188_v38  ;;  %vm121_vm4 = vcmp.eq.s32.totalorder %v3679_v23, %v3636_v2  ;;  %v156_v19 = vsel %vm124_vm11, 0.0, %v3499_v12  ;;  %v155_v23 = vsel %vm123_vm15, 0.0, %v3499_v12 }
 0x162   :  { %vm137_vm9 = vmand %vm121_vm4, %vm129_vm6 }
 0x163   :  { %vm140_vm6 = vmand %vm124_vm11, %vm132_vm13 }
 0x221   :  { %v3113_v41 = vpop.f32.mrf.mxu0 }
 0x222   :  { %v3570_v42 = vadd.f32 %v3113_v41, %v192_v40 }
 0x223   :  { %v265_v43 = vpop.f32.mrf.mxu0 }
 0x224   :  { %v3572_v44 = vadd.f32 %v265_v43, %v192_v40  ;;  %370 = vrot.lane.b32.xlu1 %v3570_v42, %s3492_s0  ;;  %278 = vrot.lane.b32.xlu0 %v3570_v42, %s3493_s2  ;;  %v146_v40 = vsel %vm138_vm8, 0.0, %v3499_v12  ;;  %vm139_vm8 = vmand %vm123_vm15, %vm131_vm3 }
 0x226   :  { %3118 = vmatprep.mubr.msk.f32.mxu1 %vm280_vm1, %v3572_v44 }
 0x228   :  { %461 = vrot.lane.b32.xlu0 %v3570_v42, %s3494_s30  ;;  %276 = vrot.lane.b32.xlu1 %v3572_v44, %s3493_s2 }
 0x22c   :  { %366 = vrot.lane.b32.xlu0 %v3570_v42, %s3495_s4  ;;  %368 = vrot.lane.b32.xlu1 %v3572_v44, %s3492_s0 }
 0x230   :  { %552 = vrot.lane.b32.xlu0 %v3570_v42, %s3496_s5  ;;  %364 = vrot.lane.b32.xlu1 %v3572_v44, %s3495_s4 }
 0x234   :  { %457 = vrot.lane.b32.xlu0 %v3570_v42, %s3497_s6  ;;  %459 = vrot.lane.b32.xlu1 %v3572_v44, %s3494_s30 }
 0x238   :  { %546 = vrot.lane.b32.xlu0 %v3572_v44, %s3498_s7  ;;  %455 = vrot.lane.b32.xlu1 %v3572_v44, %s3497_s6 }
 0x23c   :  { %550 = vrot.lane.b32.xlu1 %v3572_v44, %s3496_s5 }
 0x240   :  { %548 = vrot.lane.b32.xlu1 %v3570_v42, %s3498_s7 }
 0x296   :  { %v371_v45 = vpop.permute.xlu1 %370  ;;  %v279_v46 = vpop.permute.xlu0 %278 }
 0x297   :  { %3114 = vmatprep.subr.msk.mxu1 %vm280_vm1, %v279_v46  ;;  %3121 = vmatprep.subr.msk.mxu0 %vm280_vm1, %v371_v45 }
 0x298   :  { %3115 = vmatpush3.xpose.msk.msra.mxu1 %vm280_vm1, %v279_v46  ;;  %3122 = vmatpush3.xpose.msk.msra.mxu0 %vm280_vm1, %v371_v45  ;;  %v145_v46 = vsel %vm137_vm9, 0.0, %v3499_v12 }
 0x29a   :  { %v462_v47 = vpop.permute.xlu0 %461  ;;  %v277_v48 = vpop.permute.xlu1 %276 }
 0x29b   :  { %3116 = vmatprep.subr.msk.mxu1 %vm280_vm1, %v277_v48 }
 0x29c   :  { %3117 = vmatpush3.xpose.msk.msra.mxu1 %vm280_vm1, %v277_v48 }
 0x29d   :  { %3128 = vmatprep.subr.msk.mxu1 %vm280_vm1, %v462_v47 }
 0x29e   :  { %v367_v49 = vpop.permute.xlu0 %366  ;;  %v369_v50 = vpop.permute.xlu1 %368 }
 0x29f   :  { %3119 = vmatmul.mubr.msk.f32.vlgmr.msra.gmra.mxu1 %vm280_vm1, %v3570_v42  ;;  %3123 = vmatprep.subr.msk.mxu0 %vm280_vm1, %v369_v50 }
 0x2a0   :  { %3124 = vmatpush3.xpose.msk.msra.mxu0 %vm280_vm1, %v369_v50  ;;  %3129 = vmatpush3.xpose.msk.msra.mxu1 %vm280_vm1, %v462_v47 }
 0x2a2   :  { %v553_v51 = vpop.permute.xlu0 %552  ;;  %v365_v52 = vpop.permute.xlu1 %364 }
 0x2a3   :  { %3125 = vmatprep.mubr.msk.f32.mxu0 %vm280_vm1, %v365_v52  ;;  %3135 = vmatprep.subr.msk.mxu0 %vm280_vm1, %v553_v51  ;;  %v148_v52 = vsel %vm140_vm6, 0.0, %v3499_v12 }
 0x2a4   :  { %3126 = vmatmul.mubr.msk.f32.vlgmr.msra.gmra.mxu0 %vm280_vm1, %v367_v49 }
 0x2a5   :  { %3136 = vmatpush3.xpose.msk.msra.mxu0 %vm280_vm1, %v553_v51 }
 0x2a6   :  { %v458_v53 = vpop.permute.xlu0 %457  ;;  %v460_v54 = vpop.permute.xlu1 %459 }
 0x2a7   :  { %3130 = vmatprep.subr.msk.mxu1 %vm280_vm1, %v460_v54 }
 0x2a8   :  { %3131 = vmatpush3.xpose.msk.msra.mxu1 %vm280_vm1, %v460_v54 }
 0x2aa   :  { %v547_v55 = vpop.permute.xlu0 %546  ;;  %v456_v56 = vpop.permute.xlu1 %455 }
 0x2ab   :  { %3132 = vmatprep.mubr.msk.f32.mxu1 %vm280_vm1, %v456_v56  ;;  %3139 = vmatprep.mubr.msk.f32.mxu0 %vm280_vm1, %v547_v55  ;;  %v147_v55 = vsel %vm139_vm8, 0.0, %v3499_v12 }
 0x2ac   :  { %3133 = vmatmul.mubr.msk.f32.vlgmr.msra.gmra.mxu1 %vm280_vm1, %v458_v53 }
 0x2ae   :  { %v551_v57 = vpop.permute.xlu1 %550 }
 0x2af   :  { %3137 = vmatprep.subr.msk.mxu0 %vm280_vm1, %v551_v57 }
 0x2b0   :  { %3138 = vmatpush3.xpose.msk.msra.mxu0 %vm280_vm1, %v551_v57 }
 0x2b2   :  { %v549_v58 = vpop.permute.xlu1 %548 }
 0x2b3   :  { %3140 = vmatmul.mubr.msk.f32.vlgmr.msra.gmra.mxu0 %vm280_vm1, %v549_v58 }
 0x35f   :  { %v3120_v16 = vpop.f32.mrf.mxu1 }
 0x360   :  { %v3665_v18 = vadd.f32 %v3120_v16, %v142_v13 }
 0x361   :  { %v355_v28 = vpop.f32.mrf.mxu1 }
 0x362   :  { %v649_v22 = vsel %vm645_vm10, %v3665_v18, -inf  ;;  %v637_v34 = vadd.f32 %v355_v28, %v141_v26 }
 0x363   :  { %650 = vmax.xlane.f32.xlu1 %v649_v22 }
 0x364   :  { %v3127_v30 = vpop.f32.mrf.mxu0  ;;  %v646_v43 = vsel %vm645_vm10, %v637_v34, -inf }
 0x365   :  { %v640_v32 = vadd.f32 %v3127_v30, %v144_v20 }
 0x366   :  { %v446_v38 = vpop.f32.mrf.mxu0 }
 0x367   :  { %v655_v35 = vsel %vm645_vm10, %v640_v32, -inf  ;;  %v639_v41 = vadd.f32 %v446_v38, %v143_v37 }
 0x368   :  { %656 = vmax.xlane.f32.xlu0 %v655_v35 }
 0x369   :  { %v652_v50 = vsel %vm645_vm10, %v639_v41, -inf }
 0x36c   :  { %647 = vmax.xlane.f32.xlu0 %v646_v43  ;;  %v3134_v45 = vpop.f32.mrf.mxu1 }
 0x36d   :  { %v642_v47 = vadd.f32 %v3134_v45, %v146_v40 }
 0x36e   :  { %v537_v48 = vpop.f32.mrf.mxu1 }
 0x36f   :  { %v641_v49 = vadd.f32 %v537_v48, %v145_v46  ;;  %v661_v51 = vsel %vm645_vm10, %v642_v47, -inf }
 0x370   :  { %653 = vmax.xlane.f32.xlu0 %v652_v50  ;;  %662 = vmax.xlane.f32.xlu1 %v661_v51 }
 0x371   :  { %v658_v54 = vsel %vm645_vm10, %v641_v49, -inf }
 0x373   :  { %v3141_v53 = vpop.f32.mrf.mxu0 }
 0x374   :  { %v644_v56 = vadd.f32 %v3141_v53, %v148_v52  ;;  %659 = vmax.xlane.f32.xlu0 %v658_v54 }
 0x375   :  { %v628_v57 = vpop.f32.mrf.mxu0 }
 0x376   :  { %v643_v58 = vadd.f32 %v628_v57, %v147_v55  ;;  %v667_v59 = vsel %vm645_vm10, %v644_v56, -inf }
 0x377   :  { %668 = vmax.xlane.f32.xlu1 %v667_v59 }
 0x378   :  { %v664_v60 = vsel %vm645_vm10, %v643_v58, -inf }
 0x379   :  { %665 = vmax.xlane.f32.xlu0 %v664_v60 }
 0x388   :  { %738 = vrot.lane.b32.xlu1 %v3572_v44, %s3500_s8 }
 0x38c   :  { %910 = vrot.lane.b32.xlu1 %v3570_v42, %s3501_s9 }
 0x38f   :  { %740 = vrot.lane.b32.xlu0 %v3570_v42, %s3500_s8 }
 0x390   :  { %908 = vrot.lane.b32.xlu1 %v3572_v44, %s3501_s9 }
 0x393   :  { %1080 = vrot.lane.b32.xlu0 %v3570_v42, %s3487_s16 }
 0x394   :  { %1078 = vrot.lane.b32.xlu1 %v3572_v44, %s3487_s16 }
 0x3ec   :  { %v651_v61 = vpop.xlane.xlu1 %650 }
 0x3ed   :  { %v671_v62 = vsub.f32 %v3665_v18, %v651_v61 }
 0x3ef   :  { %v680_v3 = vmul.f32 1.442695, %v671_v62 }
 0x3f1   :  { %3322 = vpow2.f32 %v680_v3  ;;  %v657_v4 = vpop.xlane.xlu0 %656 }
 0x3f2   :  { %v673_v5 = vsub.f32 %v640_v32, %v657_v4 }
 0x3f4   :  { %v684_v7 = vmul.f32 1.442695, %v673_v5 }
 0x3f5   :  { %v648_v9 = vpop.xlane.xlu0 %647 }
 0x3f6   :  { %3324 = vpow2.f32 %v684_v7  ;;  %v670_v10 = vsub.f32 %v637_v34, %v648_v9 }
 0x3f8   :  { %v678_v11 = vmul.f32 1.442695, %v670_v10 }
 0x3f9   :  { %v654_v13 = vpop.xlane.xlu0 %653  ;;  %v663_v15 = vpop.xlane.xlu1 %662 }
 0x3fa   :  { %3326 = vpow2.f32 %v678_v11  ;;  %v672_v16 = vsub.f32 %v639_v41, %v654_v13  ;;  %v675_v17 = vsub.f32 %v642_v47, %v663_v15 }
 0x3fc   :  { %v682_v20 = vmul.f32 1.442695, %v672_v16  ;;  %v688_v21 = vmul.f32 1.442695, %v675_v17 }
 0x3fd   :  { %v660_v22 = vpop.xlane.xlu0 %659 }
 0x3fe   :  { %v3738_v24 = vpop.eup %3322  ;;  %3328 = vpow2.f32 %v682_v20  ;;  %v674_v18 = vsub.f32 %v641_v49, %v660_v22 }
 0x3ff   :  { %3330 = vpow2.f32 %v688_v21  ;;  %v697_v26 = vsel %vm645_vm10, %v3738_v24, 0.0 }
 0x400   :  { %v686_v28 = vmul.f32 1.442695, %v674_v18  ;;  %698 = vadd.xlane.f32.xlu1 %v697_v26  ;;  %v669_v30 = vpop.xlane.xlu1 %668 }
 0x401   :  { %v677_v32 = vsub.f32 %v644_v56, %v669_v30 }
 0x402   :  { %3332 = vpow2.f32 %v686_v28  ;;  %v666_v33 = vpop.xlane.xlu0 %665 }
 0x403   :  { %v3742_v34 = vpop.eup %3324  ;;  %v692_v35 = vmul.f32 1.442695, %v677_v32  ;;  %v676_v37 = vsub.f32 %v643_v58, %v666_v33 }
 0x404   :  { %v739_v38 = vpop.permute.xlu1 %738  ;;  %v703_v40 = vsel %vm645_vm10, %v3742_v34, 0.0 }
 0x405   :  { %3334 = vpow2.f32 %v692_v35  ;;  %v690_v41 = vmul.f32 1.442695, %v676_v37  ;;  %704 = vadd.xlane.f32.xlu1 %v703_v40  ;;  %v58_v35 = vld [vmem:[#allocation5 + $0x10] sm:$0xff]  ;;  %v64_v37 = vld [vmem:[#allocation5 + $0x40] sm:$0xff] }
 0x406   :  { %v741_v43 = vpop.permute.xlu0 %740 }
 0x407   :  { %v3327_v45 = vpop.eup %3326  ;;  %3336 = vpow2.f32 %v690_v41  ;;  %3142 = vmatprep.subr.mxu1 %v741_v43  ;;  %v70_v41 = vld [vmem:[#allocation5 + $0x70] sm:$0xff] }
 0x408   :  { %v911_v46 = vpop.permute.xlu1 %910  ;;  %3143 = vmatpush3.msra.mxu1 %v741_v43  ;;  %v694_v47 = vsel %vm645_vm10, %v3327_v45, 0.0 }
 0x409   :  { %3154 = vmatprep.subr.mxu0 %v911_v46  ;;  %695 = vadd.xlane.f32.xlu0 %v694_v47 }
 0x40a   :  { %3144 = vmatprep.subr.mxu1 %v739_v38  ;;  %3155 = vmatpush3.msra.mxu0 %v911_v46  ;;  %v1081_v53 = vpop.permute.xlu0 %1080  ;;  %v76_v46 = vld [vmem:[#allocation5 + $0xa0] sm:$0xff] }
 0x40b   :  { %v3329_v48 = vpop.eup %3328  ;;  %3145 = vmatpush3.msra.mxu1 %v739_v38 }
 0x40c   :  { %v3331_v49 = vpop.eup %3330  ;;  %v909_v50 = vpop.permute.xlu1 %908  ;;  %v700_v51 = vsel %vm645_vm10, %v3329_v48, 0.0  ;;  %3149 = vmatprep.subr.mxu1 %v58_v35 }
 0x40d   :  { %v709_v52 = vsel %vm645_vm10, %v3331_v49, 0.0  ;;  %3156 = vmatprep.subr.mxu0 %v909_v50  ;;  %701 = vadd.xlane.f32.xlu0 %v700_v51  ;;  %v736_v51 = vsub.s32 2, %v3550_v25 }
 0x40e   :  { %710 = vadd.xlane.f32.xlu1 %v709_v52  ;;  %3157 = vmatpush3.msra.mxu0 %v909_v50 }
 0x40f   :  { %v3333_v54 = vpop.eup %3332  ;;  %3166 = vmatprep.subr.mxu0 %v1081_v53 }
 0x410   :  { %v706_v55 = vsel %vm645_vm10, %v3333_v54, 0.0  ;;  %v1079_v60 = vpop.permute.xlu1 %1078 }
 0x411   :  { %707 = vadd.xlane.f32.xlu0 %v706_v55 }
 0x412   :  { %v3335_v56 = vpop.eup %3334 }
 0x413   :  { %v715_v57 = vsel %vm645_vm10, %v3335_v56, 0.0 }
 0x414   :  { %v3337_v58 = vpop.eup %3336  ;;  %716 = vadd.xlane.f32.xlu1 %v715_v57 }
 0x415   :  { %v712_v59 = vsel %vm645_vm10, %v3337_v58, 0.0 }
 0x416   :  { %713 = vadd.xlane.f32.xlu0 %v712_v59 }
 0x425   :  { %1248 = vrot.lane.b32.xlu1 %v3572_v44, %s3502_s10 }
 0x42c   :  { %1250 = vrot.lane.b32.xlu0 %v3570_v42, %s3502_s10 }
 0x489   :  { %v699_v61 = vpop.xlane.xlu1 %698 }
 0x48a   :  { %3338 = vrcp.f32 %v699_v61 }
 0x48e   :  { %v705_v3 = vpop.xlane.xlu1 %704 }
 0x492   :  { %v696_v62 = vpop.xlane.xlu0 %695 }
 0x493   :  { %3340 = vrcp.f32 %v696_v62 }
 0x494   :  { %3342 = vrcp.f32 %v705_v3 }
 0x496   :  { %v702_v4 = vpop.xlane.xlu0 %701 }
 0x497   :  { %v711_v5 = vpop.xlane.xlu1 %710  ;;  %3344 = vrcp.f32 %v702_v4  ;;  %v3339_v10 = vpop.eup %3338 }
 0x498   :  { %3346 = vrcp.f32 %v711_v5  ;;  %v727_v13 = vmul.f32 %v3339_v10, %v3738_v24 }
 0x49a   :  { %v708_v7 = vpop.xlane.xlu0 %707 }
 0x49b   :  { %3348 = vrcp.f32 %v708_v7 }
 0x49d   :  { %v717_v9 = vpop.xlane.xlu1 %716 }
 0x49e   :  { %3350 = vrcp.f32 %v717_v9 }
 0x49f   :  { %v714_v44 = vpop.xlane.xlu0 %713 }
 0x4a0   :  { %v3341_v11 = vpop.eup %3340  ;;  %3352 = vrcp.f32 %v714_v44 }
 0x4a1   :  { %v726_v42 = vmul.f32 %v3341_v11, %v3327_v45  ;;  %v3343_v15 = vpop.eup %3342  ;;  %v1249_v32 = vpop.permute.xlu1 %1248 }
 0x4a2   :  { %v729_v20 = vmul.f32 %v3343_v15, %v3742_v34 }
 0x4a3   :  { %3146 = vmatprep.mubr.msk.f32.mxu1 %vm645_vm10, %v726_v42  ;;  %v1251_v24 = vpop.permute.xlu0 %1250 }
 0x4a4   :  { %v3345_v16 = vpop.eup %3344  ;;  %3147 = vmatmul.mubr.msk.f32.vlgmr.msra.gmra.mxu1 %vm645_vm10, %v727_v13 }
 0x4a5   :  { %v728_v17 = vmul.f32 %v3345_v16, %v3329_v48  ;;  %v3347_v21 = vpop.eup %3346  ;;  %3150 = vmatpush3.msra.mxu1 %v58_v35 }
 0x4a6   :  { %v731_v26 = vmul.f32 %v3347_v21, %v3331_v49  ;;  %3161 = vmatprep.subr.mxu1 %v64_v37 }
 0x4a7   :  { %3158 = vmatprep.mubr.msk.f32.mxu0 %vm645_vm10, %v728_v17 }
 0x4a8   :  { %v3349_v22 = vpop.eup %3348  ;;  %3159 = vmatmul.mubr.msk.f32.vlgmr.msra.gmra.mxu0 %vm645_vm10, %v729_v20 }
 0x4a9   :  { %3167 = vmatpush3.msra.mxu0 %v1081_v53  ;;  %v730_v18 = vmul.f32 %v3349_v22, %v3333_v54  ;;  %v737_v54 = vrot.slane %v3553_v27, %v736_v51  ;;  %v1452_v51 = vsub.s32 1, %v3550_v25 }
 0x4aa   :  { %3168 = vmatprep.subr.mxu0 %v1079_v60 }
 0x4ab   :  { %3169 = vmatpush3.msra.mxu0 %v1079_v60  ;;  %3170 = vmatprep.mubr.msk.f32.mxu0 %vm645_vm10, %v730_v18  ;;  %v3351_v28 = vpop.eup %3350 }
 0x4ac   :  { %3178 = vmatprep.subr.mxu0 %v1251_v24  ;;  %3171 = vmatmul.mubr.msk.f32.vlgmr.msra.gmra.mxu0 %vm645_vm10, %v731_v26  ;;  %v733_v34 = vmul.f32 %v3351_v28, %v3335_v56  ;;  %v69_v28 = vld [vmem:[#allocation5 + $0x68] sm:$0xff] }
 0x4ad   :  { %v3353_v30 = vpop.eup %3352  ;;  %3179 = vmatpush3.msra.mxu0 %v1251_v24  ;;  %v75_v24 = vld [vmem:[#allocation5 + $0x98] sm:$0xff] }
 0x4ae   :  { %3180 = vmatprep.subr.mxu0 %v1249_v32  ;;  %v732_v33 = vmul.f32 %v3353_v30, %v3337_v58  ;;  %v63_v30 = vld [vmem:[#allocation5 + $0x38] sm:$0xff] }
 0x4af   :  { %3181 = vmatpush3.msra.mxu0 %v1249_v32  ;;  %v57_v32 = vld [vmem:[#allocation5 + $0x8] sm:$0xff] }
 0x4b0   :  { %3182 = vmatprep.mubr.msk.f32.mxu0 %vm645_vm10, %v732_v33  ;;  %3190 = vmatprep.subr.mxu0 %v75_v24 }
 0x4b1   :  { %3183 = vmatmul.mubr.msk.f32.vlgmr.msra.gmra.mxu0 %vm645_vm10, %v733_v34 }
 0x4b2   :  { %3191 = vmatpush3.msra.mxu0 %v75_v24 }
 0x4b3   :  { %3192 = vmatprep.subr.mxu0 %v69_v28 }
 0x4b4   :  { %3193 = vmatpush3.msra.mxu0 %v69_v28 }
 0x4b5   :  { %3194 = vmatprep.subr.mxu0 %v63_v30 }
 0x4b6   :  { %3195 = vmatpush3.msra.mxu0 %v63_v30 }
 0x4b7   :  { %3196 = vmatprep.subr.mxu0 %v57_v32 }
 0x4b8   :  { %3197 = vmatpush3.msra.mxu0 %v57_v32  ;;  %v153_v32 = vsel %vm121_vm4, 0.0, %v3499_v12 }
 0x564   :  { %v3148_v38 = vpop.f32.mrf.mxu1 }
 0x566   :  { %v816_v40 = vpop.f32.mrf.mxu1 }
 0x567   :  { %3151 = vmatprep.mubr.msk.f32.mxu1 %vm280_vm1, %v816_v40 }
 0x568   :  { %3152 = vmatmul.mubr.msk.f32.vlgmr.msra.gmra.mxu1 %vm280_vm1, %v3148_v38  ;;  %v3160_v43 = vpop.f32.mrf.mxu0 }
 0x569   :  { %3162 = vmatpush3.msra.mxu1 %v64_v37 }
 0x56a   :  { %v986_v45 = vpop.f32.mrf.mxu0  ;;  %3173 = vmatprep.subr.mxu1 %v70_v41 }
 0x56b   :  { %3163 = vmatprep.mubr.msk.f32.mxu1 %vm280_vm1, %v986_v45 }
 0x56c   :  { %3164 = vmatmul.mubr.msk.f32.vlgmr.msra.gmra.mxu1 %vm280_vm1, %v3160_v43  ;;  %v3172_v47 = vpop.f32.mrf.mxu0 }
 0x56d   :  { %3174 = vmatpush3.msra.mxu1 %v70_v41 }
 0x56e   :  { %v1156_v48 = vpop.f32.mrf.mxu0  ;;  %3185 = vmatprep.subr.mxu1 %v76_v46 }
 0x56f   :  { %3175 = vmatprep.mubr.msk.f32.mxu1 %vm280_vm1, %v1156_v48 }
 0x570   :  { %3176 = vmatmul.mubr.msk.f32.vlgmr.msra.gmra.mxu1 %vm280_vm1, %v3172_v47 }
 0x571   :  { %v3184_v49 = vpop.f32.mrf.mxu0  ;;  %3186 = vmatpush3.msra.mxu1 %v76_v46 }
 0x573   :  { %v1326_v50 = vpop.f32.mrf.mxu0 }
 0x574   :  { %3187 = vmatprep.mubr.msk.f32.mxu1 %vm280_vm1, %v1326_v50 }
 0x575   :  { %3188 = vmatmul.mubr.msk.f32.vlgmr.msra.gmra.mxu1 %vm280_vm1, %v3184_v49 }
 0x628   :  { %v3153_v52 = vpop.f32.mrf.mxu1 }
 0x629   :  { %v907_v57 = vadd.f32 %v3153_v52, %v737_v54  ;;  %v1453_v52 = vrot.slane %v3553_v27, %v1452_v51 }
 0x62a   :  { %v897_v53 = vpop.f32.mrf.mxu1 }
 0x62b   :  { %v906_v59 = vadd.f32 %v897_v53, %v737_v54 }
 0x62c   :  { %v3165_v55 = vpop.f32.mrf.mxu1 }
 0x62d   :  { %v1077_v60 = vadd.f32 %v3165_v55, %v907_v57 }
 0x62e   :  { %v1067_v56 = vpop.f32.mrf.mxu1 }
 0x62f   :  { %v1076_v62 = vadd.f32 %v1067_v56, %v906_v59 }
 0x630   :  { %v3177_v58 = vpop.f32.mrf.mxu1 }
 0x631   :  { %v1247_v3 = vadd.f32 %v3177_v58, %v1077_v60 }
 0x632   :  { %v1237_v61 = vpop.f32.mrf.mxu1 }
 0x633   :  { %v1246_v5 = vadd.f32 %v1237_v61, %v1076_v62 }
 0x635   :  { %v3189_v4 = vpop.f32.mrf.mxu1 }
 0x636   :  { %v1417_v7 = vadd.f32 %v3189_v4, %v1247_v3 }
 0x637   :  { %v1407_v9 = vpop.f32.mrf.mxu1 }
 0x638   :  { %v3777_v10 = vadd.f32 %v1417_v7, %v3539_v1  ;;  %v1416_v44 = vadd.f32 %v1407_v9, %v1246_v5 }
 0x63a   :  { %v3780_v11 = vadd.f32 %v1416_v44, %v3537_v0  ;;  %v1423_v42 = vsel %vm157_vm0, %v3777_v10, 0.0 }
 0x63b   :  { %1424 = vadd.xlane.f32.xlu1 %v1423_v42 }
 0x63c   :  { %v1420_v13 = vsel %vm157_vm0, %v3780_v11, 0.0 }
 0x63d   :  { %1421 = vadd.xlane.f32.xlu0 %v1420_v13  ;;  %v150_v13 = vsel %vm118_vm2, 0.0, %v3499_v12 }
 0x6c4   :  { %v1425_v15 = vpop.xlane.xlu1 %1424 }
 0x6c5   :  { %v1427_v16 = vmul.f32 0.03125, %v1425_v15 }
 0x6c6   :  { %v1422_v17 = vpop.xlane.xlu0 %1421 }
 0x6c7   :  { %v1426_v20 = vmul.f32 0.03125, %v1422_v17  ;;  %v1429_v21 = vsub.f32 %v3777_v10, %v1427_v16 }
 0x6c9   :  { %v1428_v1 = vsub.f32 %v3780_v11, %v1426_v20  ;;  %v1431_v18 = vmul.f32 %v1429_v21, %v1429_v21  ;;  %v152_v20 = vsel %vm120_vm5, 0.0, %v3499_v12 }
 0x6cb   :  { %v1430_v22 = vmul.f32 %v1428_v1, %v1428_v1  ;;  %v1435_v26 = vsel %vm157_vm0, %v1431_v18, 0.0 }
 0x6cd   :  { %v1432_v0 = vsel %vm157_vm0, %v1430_v22, 0.0 }
 0x6ce   :  { %1433 = vadd.xlane.f32.xlu0 %v1432_v0 }
 0x6d2   :  { %1436 = vadd.xlane.f32.xlu0 %v1435_v26  ;;  %v151_v26 = vsel %vm119_vm12, 0.0, %v3499_v12 }
 0x757   :  { %v1434_v33 = vpop.xlane.xlu0 %1433 }
 0x758   :  { %v1438_v34 = vmul.f32 0.03125, %v1434_v33 }
 0x75a   :  { %v1440_v35 = vadd.f32 1e-05, %v1438_v34 }
 0x75b   :  { %v1437_v37 = vpop.xlane.xlu0 %1436 }
 0x75c   :  { %3354 = vrsqrt.f32 %v1440_v35  ;;  %v1439_v38 = vmul.f32 0.03125, %v1437_v37 }
 0x75e   :  { %v1441_v40 = vadd.f32 1e-05, %v1439_v38 }
 0x760   :  { %3356 = vrsqrt.f32 %v1441_v40 }
 0x769   :  { %v3355_v41 = vpop.eup %3354 }
 0x76a   :  { %v1444_v43 = vmul.f32 %v3355_v41, %v1428_v1 }
 0x76c   :  { %v1446_v45 = vmul.f32 %v1444_v43, %v3557_v29 }
 0x76d   :  { %v3357_v46 = vpop.eup %3356 }
 0x76e   :  { %v1445_v47 = vmul.f32 %v3357_v46, %v1429_v21  ;;  %v1448_v48 = vadd.f32 %v1446_v45, %v3560_v31  ;;  %v149_v21 = vsel %vm117_vm7, 0.0, %v3499_v12 }
 0x770   :  { %3198 = vmatprep.mubr.msk.f32.mxu0 %vm157_vm0, %v1448_v48  ;;  %v1447_v49 = vmul.f32 %v1445_v47, %v3557_v29 }
 0x772   :  { %v1449_v50 = vadd.f32 %v1447_v49, %v3560_v31 }
 0x774   :  { %3199 = vmatmul.mubr.msk.f32.vlgmr.msra.gmra.mxu0 %vm157_vm0, %v1449_v50 }
 0x834   :  { %v3200_v53 = vpop.f32.mrf.mxu0 }
 0x835   :  { %v3798_v54 = vadd.f32 %v3200_v53, %v1453_v52 }
 0x836   :  { %v1526_v55 = vpop.f32.mrf.mxu0 }
 0x837   :  { %v3800_v56 = vadd.f32 %v1526_v55, %v1453_v52  ;;  %1630 = vrot.lane.b32.xlu1 %v3798_v54, %s3492_s0  ;;  %1539 = vrot.lane.b32.xlu0 %v3798_v54, %s3493_s2 }
 0x839   :  { %3205 = vmatprep.mubr.msk.f32.mxu1 %vm280_vm1, %v3800_v56 }
 0x83b   :  { %1721 = vrot.lane.b32.xlu0 %v3798_v54, %s3494_s30  ;;  %1537 = vrot.lane.b32.xlu1 %v3800_v56, %s3493_s2 }
 0x83f   :  { %1626 = vrot.lane.b32.xlu0 %v3798_v54, %s3495_s4  ;;  %1628 = vrot.lane.b32.xlu1 %v3800_v56, %s3492_s0 }
 0x843   :  { %1812 = vrot.lane.b32.xlu0 %v3798_v54, %s3496_s5  ;;  %1624 = vrot.lane.b32.xlu1 %v3800_v56, %s3495_s4 }
 0x847   :  { %1717 = vrot.lane.b32.xlu0 %v3798_v54, %s3497_s6  ;;  %1719 = vrot.lane.b32.xlu1 %v3800_v56, %s3494_s30 }
 0x84b   :  { %1806 = vrot.lane.b32.xlu0 %v3800_v56, %s3498_s7  ;;  %1715 = vrot.lane.b32.xlu1 %v3800_v56, %s3497_s6 }
 0x84f   :  { %1810 = vrot.lane.b32.xlu1 %v3800_v56, %s3496_s5 }
 0x853   :  { %1808 = vrot.lane.b32.xlu1 %v3798_v54, %s3498_s7 }
 0x8a9   :  { %v1631_v27 = vpop.permute.xlu1 %1630  ;;  %v1540_v57 = vpop.permute.xlu0 %1539 }
 0x8aa   :  { %3201 = vmatprep.subr.msk.mxu1 %vm280_vm1, %v1540_v57  ;;  %3208 = vmatprep.subr.msk.mxu0 %vm280_vm1, %v1631_v27 }
 0x8ab   :  { %3202 = vmatpush3.xpose.msk.msra.mxu1 %vm280_vm1, %v1540_v57  ;;  %3209 = vmatpush3.xpose.msk.msra.mxu0 %vm280_vm1, %v1631_v27 }
 0x8ad   :  { %v1722_v58 = vpop.permute.xlu0 %1721  ;;  %v1538_v59 = vpop.permute.xlu1 %1537 }
 0x8ae   :  { %3203 = vmatprep.subr.msk.mxu1 %vm280_vm1, %v1538_v59 }
 0x8af   :  { %3204 = vmatpush3.xpose.msk.msra.mxu1 %vm280_vm1, %v1538_v59 }
 0x8b0   :  { %3215 = vmatprep.subr.msk.mxu1 %vm280_vm1, %v1722_v58 }
 0x8b1   :  { %v1627_v60 = vpop.permute.xlu0 %1626  ;;  %v1629_v61 = vpop.permute.xlu1 %1628 }
 0x8b2   :  { %3206 = vmatmul.mubr.msk.f32.vlgmr.msra.gmra.mxu1 %vm280_vm1, %v3798_v54  ;;  %3210 = vmatprep.subr.msk.mxu0 %vm280_vm1, %v1629_v61 }
 0x8b3   :  { %3211 = vmatpush3.xpose.msk.msra.mxu0 %vm280_vm1, %v1629_v61  ;;  %3216 = vmatpush3.xpose.msk.msra.mxu1 %vm280_vm1, %v1722_v58 }
 0x8b5   :  { %v1813_v62 = vpop.permute.xlu0 %1812  ;;  %v1625_v3 = vpop.permute.xlu1 %1624 }
 0x8b6   :  { %3212 = vmatprep.mubr.msk.f32.mxu0 %vm280_vm1, %v1625_v3  ;;  %3222 = vmatprep.subr.msk.mxu0 %vm280_vm1, %v1813_v62 }
 0x8b7   :  { %3213 = vmatmul.mubr.msk.f32.vlgmr.msra.gmra.mxu0 %vm280_vm1, %v1627_v60 }
 0x8b8   :  { %3223 = vmatpush3.xpose.msk.msra.mxu0 %vm280_vm1, %v1813_v62 }
 0x8b9   :  { %v1718_v4 = vpop.permute.xlu0 %1717  ;;  %v1720_v5 = vpop.permute.xlu1 %1719 }
 0x8ba   :  { %3217 = vmatprep.subr.msk.mxu1 %vm280_vm1, %v1720_v5 }
 0x8bb   :  { %3218 = vmatpush3.xpose.msk.msra.mxu1 %vm280_vm1, %v1720_v5 }
 0x8bd   :  { %v1807_v7 = vpop.permute.xlu0 %1806  ;;  %v1716_v9 = vpop.permute.xlu1 %1715 }
 0x8be   :  { %3219 = vmatprep.mubr.msk.f32.mxu1 %vm280_vm1, %v1716_v9  ;;  %3226 = vmatprep.mubr.msk.f32.mxu0 %vm280_vm1, %v1807_v7 }
 0x8bf   :  { %3220 = vmatmul.mubr.msk.f32.vlgmr.msra.gmra.mxu1 %vm280_vm1, %v1718_v4 }
 0x8c1   :  { %v1811_v44 = vpop.permute.xlu1 %1810 }
 0x8c2   :  { %3224 = vmatprep.subr.msk.mxu0 %vm280_vm1, %v1811_v44 }
 0x8c3   :  { %3225 = vmatpush3.xpose.msk.msra.mxu0 %vm280_vm1, %v1811_v44 }
 0x8c5   :  { %v1809_v42 = vpop.permute.xlu1 %1808 }
 0x8c6   :  { %3227 = vmatmul.mubr.msk.f32.vlgmr.msra.gmra.mxu0 %vm280_vm1, %v1809_v42 }
 0x972   :  { %v3207_v15 = vpop.f32.mrf.mxu1 }
 0x973   :  { %v1898_v16 = vadd.f32 %v3207_v15, %v150_v13 }
 0x974   :  { %v1615_v1 = vpop.f32.mrf.mxu1 }
 0x975   :  { %v1908_v17 = vsel %vm645_vm10, %v1898_v16, -inf  ;;  %v1897_v63 = vadd.f32 %v1615_v1, %v149_v21 }
 0x976   :  { %1909 = vmax.xlane.f32.xlu1 %v1908_v17 }
 0x977   :  { %v3214_v22 = vpop.f32.mrf.mxu0  ;;  %v1905_v28 = vsel %vm645_vm10, %v1897_v63, -inf }
 0x978   :  { %v1900_v0 = vadd.f32 %v3214_v22, %v152_v20 }
 0x979   :  { %v1706_v24 = vpop.f32.mrf.mxu0 }
 0x97a   :  { %v1914_v18 = vsel %vm645_vm10, %v1900_v0, -inf  ;;  %v1899_v8 = vadd.f32 %v1706_v24, %v151_v26 }
 0x97b   :  { %1915 = vmax.xlane.f32.xlu0 %v1914_v18 }
 0x97c   :  { %v1911_v35 = vsel %vm645_vm10, %v1899_v8, -inf }
 0x97f   :  { %1906 = vmax.xlane.f32.xlu0 %v1905_v28  ;;  %v3221_v30 = vpop.f32.mrf.mxu1 }
 0x980   :  { %v1902_v33 = vadd.f32 %v3221_v30, %v154_v6 }
 0x981   :  { %v1797_v14 = vpop.f32.mrf.mxu1 }
 0x982   :  { %v1901_v34 = vadd.f32 %v1797_v14, %v153_v32  ;;  %v1920_v37 = vsel %vm645_vm10, %v1902_v33, -inf }
 0x983   :  { %1912 = vmax.xlane.f32.xlu0 %v1911_v35  ;;  %1921 = vmax.xlane.f32.xlu1 %v1920_v37 }
 0x984   :  { %v1917_v40 = vsel %vm645_vm10, %v1901_v34, -inf }
 0x986   :  { %v3228_v38 = vpop.f32.mrf.mxu0 }
 0x987   :  { %v1904_v41 = vadd.f32 %v3228_v38, %v156_v19  ;;  %1918 = vmax.xlane.f32.xlu0 %v1917_v40 }
 0x988   :  { %v1888_v43 = vpop.f32.mrf.mxu0 }
 0x989   :  { %v1903_v45 = vadd.f32 %v1888_v43, %v155_v23  ;;  %v1926_v46 = vsel %vm645_vm10, %v1904_v41, -inf }
 0x98a   :  { %1927 = vmax.xlane.f32.xlu1 %v1926_v46 }
 0x98b   :  { %v1923_v47 = vsel %vm645_vm10, %v1903_v45, -inf }
 0x98c   :  { %1924 = vmax.xlane.f32.xlu0 %v1923_v47 }
 0x99b   :  { %1997 = vrot.lane.b32.xlu1 %v3800_v56, %s3500_s8 }
 0x99f   :  { %2169 = vrot.lane.b32.xlu1 %v3798_v54, %s3501_s9 }
 0x9a2   :  { %1999 = vrot.lane.b32.xlu0 %v3798_v54, %s3500_s8 }
 0x9a3   :  { %2167 = vrot.lane.b32.xlu1 %v3800_v56, %s3501_s9 }
 0x9a6   :  { %2339 = vrot.lane.b32.xlu0 %v3798_v54, %s3487_s16 }
 0x9a7   :  { %2337 = vrot.lane.b32.xlu1 %v3800_v56, %s3487_s16 }
 0x9ff   :  { %v1910_v2 = vpop.xlane.xlu1 %1909 }
 0xa00   :  { %v1930_v12 = vsub.f32 %v1898_v16, %v1910_v2 }
 0xa02   :  { %v1939_v36 = vmul.f32 1.442695, %v1930_v12 }
 0xa04   :  { %3358 = vpow2.f32 %v1939_v36  ;;  %v1916_v39 = vpop.xlane.xlu0 %1915 }
 0xa05   :  { %v1932_v48 = vsub.f32 %v1900_v0, %v1916_v39 }
 0xa07   :  { %v1943_v49 = vmul.f32 1.442695, %v1932_v48 }
 0xa08   :  { %v1907_v50 = vpop.xlane.xlu0 %1906 }
 0xa09   :  { %3360 = vpow2.f32 %v1943_v49  ;;  %v1929_v51 = vsub.f32 %v1897_v63, %v1907_v50 }
 0xa0b   :  { %v1937_v52 = vmul.f32 1.442695, %v1929_v51 }
 0xa0c   :  { %v1913_v53 = vpop.xlane.xlu0 %1912  ;;  %v1922_v55 = vpop.xlane.xlu1 %1921 }
 0xa0d   :  { %3362 = vpow2.f32 %v1937_v52  ;;  %v1931_v27 = vsub.f32 %v1899_v8, %v1913_v53  ;;  %v1934_v57 = vsub.f32 %v1902_v33, %v1922_v55 }
 0xa0f   :  { %v1941_v58 = vmul.f32 1.442695, %v1931_v27  ;;  %v1947_v59 = vmul.f32 1.442695, %v1934_v57 }
 0xa10   :  { %v1919_v60 = vpop.xlane.xlu0 %1918 }
 0xa11   :  { %v3908_v61 = vpop.eup %3358  ;;  %3364 = vpow2.f32 %v1941_v58  ;;  %v1933_v62 = vsub.f32 %v1901_v34, %v1919_v60  ;;  %v59_v58 = vld [vmem:[#allocation5 + $0x18] sm:$0xff] }
 0xa12   :  { %3366 = vpow2.f32 %v1947_v59  ;;  %v1956_v3 = vsel %vm645_vm10, %v3908_v61, 0.0  ;;  %v65_v59 = vld [vmem:[#allocation5 + $0x48] sm:$0xff] }
 0xa13   :  { %v1945_v4 = vmul.f32 1.442695, %v1933_v62  ;;  %1957 = vadd.xlane.f32.xlu1 %v1956_v3  ;;  %v1928_v5 = vpop.xlane.xlu1 %1927  ;;  %v71_v62 = vld [vmem:[#allocation5 + $0x78] sm:$0xff] }
 0xa14   :  { %v1936_v7 = vsub.f32 %v1904_v41, %v1928_v5  ;;  %v77_v5 = vld [vmem:[#allocation5 + $0xa8] sm:$0xff] }
 0xa15   :  { %3368 = vpow2.f32 %v1945_v4  ;;  %v1925_v9 = vpop.xlane.xlu0 %1924 }
 0xa16   :  { %v3912_v44 = vpop.eup %3360  ;;  %v1951_v42 = vmul.f32 1.442695, %v1936_v7  ;;  %v1935_v13 = vsub.f32 %v1903_v45, %v1925_v9 }
 0xa17   :  { %v1998_v15 = vpop.permute.xlu1 %1997  ;;  %v1962_v16 = vsel %vm645_vm10, %v3912_v44, 0.0 }
 0xa18   :  { %3370 = vpow2.f32 %v1951_v42  ;;  %v1949_v17 = vmul.f32 1.442695, %v1935_v13  ;;  %1963 = vadd.xlane.f32.xlu1 %v1962_v16  ;;  %v1995_v13 = vsub.s32 3, %v3550_v25 }
 0xa19   :  { %v2000_v20 = vpop.permute.xlu0 %1999 }
 0xa1a   :  { %v3363_v21 = vpop.eup %3362  ;;  %3372 = vpow2.f32 %v1949_v17  ;;  %3229 = vmatprep.subr.mxu1 %v2000_v20  ;;  %v3945_v17 = vld [vmem:[#allocation7] sm:$0xff] }
 0xa1b   :  { %v2170_v1 = vpop.permute.xlu1 %2169  ;;  %3230 = vmatpush3.msra.mxu1 %v2000_v20  ;;  %v1953_v22 = vsel %vm645_vm10, %v3363_v21, 0.0  ;;  %v1996_v20 = vrot.slane %v3945_v17, %v1995_v13 }
 0xa1c   :  { %3241 = vmatprep.subr.mxu0 %v2170_v1  ;;  %1954 = vadd.xlane.f32.xlu0 %v1953_v22 }
 0xa1d   :  { %3231 = vmatprep.subr.mxu1 %v1998_v15  ;;  %3242 = vmatpush3.msra.mxu0 %v2170_v1  ;;  %v2340_v6 = vpop.permute.xlu0 %2339 }
 0xa1e   :  { %v3365_v0 = vpop.eup %3364  ;;  %3232 = vmatpush3.msra.mxu1 %v1998_v15 }
 0xa1f   :  { %v3367_v63 = vpop.eup %3366  ;;  %v2168_v18 = vpop.permute.xlu1 %2167  ;;  %v1959_v26 = vsel %vm645_vm10, %v3365_v0, 0.0  ;;  %3236 = vmatprep.subr.mxu1 %v59_v58 }
 0xa20   :  { %v1968_v24 = vsel %vm645_vm10, %v3367_v63, 0.0  ;;  %3243 = vmatprep.subr.mxu0 %v2168_v18  ;;  %1960 = vadd.xlane.f32.xlu0 %v1959_v26 }
 0xa21   :  { %1969 = vadd.xlane.f32.xlu1 %v1968_v24  ;;  %3244 = vmatpush3.msra.mxu0 %v2168_v18 }
 0xa22   :  { %v3369_v8 = vpop.eup %3368  ;;  %3253 = vmatprep.subr.mxu0 %v2340_v6 }
 0xa23   :  { %v1965_v28 = vsel %vm645_vm10, %v3369_v8, 0.0  ;;  %v2338_v34 = vpop.permute.xlu1 %2337 }
 0xa24   :  { %1966 = vadd.xlane.f32.xlu0 %v1965_v28 }
 0xa25   :  { %v3371_v30 = vpop.eup %3370 }
 0xa26   :  { %v1974_v32 = vsel %vm645_vm10, %v3371_v30, 0.0 }
 0xa27   :  { %v3373_v33 = vpop.eup %3372  ;;  %1975 = vadd.xlane.f32.xlu1 %v1974_v32 }
 0xa28   :  { %v1971_v14 = vsel %vm645_vm10, %v3373_v33, 0.0 }
 0xa29   :  { %1972 = vadd.xlane.f32.xlu0 %v1971_v14 }
 0xa38   :  { %2507 = vrot.lane.b32.xlu1 %v3800_v56, %s3502_s10 }
 0xa3f   :  { %2509 = vrot.lane.b32.xlu0 %v3798_v54, %s3502_s10 }
 0xa9c   :  { %v1958_v35 = vpop.xlane.xlu1 %1957 }
 0xa9d   :  { %3374 = vrcp.f32 %v1958_v35 }
 0xaa1   :  { %v1964_v19 = vpop.xlane.xlu1 %1963 }
 0xaa5   :  { %v1955_v37 = vpop.xlane.xlu0 %1954 }
 0xaa6   :  { %3376 = vrcp.f32 %v1955_v37 }
 0xaa7   :  { %3378 = vrcp.f32 %v1964_v19 }
 0xaa9   :  { %v1961_v38 = vpop.xlane.xlu0 %1960 }
 0xaaa   :  { %v1970_v40 = vpop.xlane.xlu1 %1969  ;;  %3380 = vrcp.f32 %v1961_v38  ;;  %v3375_v43 = vpop.eup %3374 }
 0xaab   :  { %3382 = vrcp.f32 %v1970_v40  ;;  %v1986_v46 = vmul.f32 %v3375_v43, %v3908_v61 }
 0xaad   :  { %v1967_v23 = vpop.xlane.xlu0 %1966 }
 0xaae   :  { %3384 = vrcp.f32 %v1967_v23 }
 0xab0   :  { %v1976_v41 = vpop.xlane.xlu1 %1975 }
 0xab1   :  { %3386 = vrcp.f32 %v1976_v41 }
 0xab2   :  { %v1973_v56 = vpop.xlane.xlu0 %1972 }
 0xab3   :  { %v3377_v45 = vpop.eup %3376  ;;  %3388 = vrcp.f32 %v1973_v56 }
 0xab4   :  { %v1985_v54 = vmul.f32 %v3377_v45, %v3363_v21  ;;  %v3379_v47 = vpop.eup %3378  ;;  %v2508_v55 = vpop.permute.xlu1 %2507 }
 0xab5   :  { %v1988_v36 = vmul.f32 %v3379_v47, %v3912_v44  ;;  %v66_v47 = vld [vmem:[#allocation5 + $0x50] sm:$0xff] }
 0xab6   :  { %3233 = vmatprep.mubr.msk.f32.mxu1 %vm645_vm10, %v1985_v54  ;;  %v2510_v51 = vpop.permute.xlu0 %2509  ;;  %v78_v54 = vld [vmem:[#allocation5 + $0xb0] sm:$0xff] }
 0xab7   :  { %v3381_v2 = vpop.eup %3380  ;;  %3234 = vmatmul.mubr.msk.f32.vlgmr.msra.gmra.mxu1 %vm645_vm10, %v1986_v46  ;;  %v72_v46 = vld [vmem:[#allocation5 + $0x80] sm:$0xff] }
 0xab8   :  { %v1987_v12 = vmul.f32 %v3381_v2, %v3365_v0  ;;  %v3383_v39 = vpop.eup %3382  ;;  %3237 = vmatpush3.msra.mxu1 %v59_v58  ;;  %v60_v2 = vld [vmem:[#allocation5 + $0x20] sm:$0xff] }
 0xab9   :  { %v1990_v50 = vmul.f32 %v3383_v39, %v3367_v63  ;;  %3248 = vmatprep.subr.mxu1 %v65_v59 }
 0xaba   :  { %3245 = vmatprep.mubr.msk.f32.mxu0 %vm645_vm10, %v1987_v12 }
 0xabb   :  { %v3385_v48 = vpop.eup %3384  ;;  %3246 = vmatmul.mubr.msk.f32.vlgmr.msra.gmra.mxu0 %vm645_vm10, %v1988_v36 }
 0xabc   :  { %3254 = vmatpush3.msra.mxu0 %v2340_v6  ;;  %v1989_v49 = vmul.f32 %v3385_v48, %v3369_v8 }
 0xabd   :  { %3255 = vmatprep.subr.mxu0 %v2338_v34 }
 0xabe   :  { %3256 = vmatpush3.msra.mxu0 %v2338_v34  ;;  %3257 = vmatprep.mubr.msk.f32.mxu0 %vm645_vm10, %v1989_v49  ;;  %v3387_v52 = vpop.eup %3386 }
 0xabf   :  { %3265 = vmatprep.subr.mxu0 %v2510_v51  ;;  %3258 = vmatmul.mubr.msk.f32.vlgmr.msra.gmra.mxu0 %vm645_vm10, %v1990_v50  ;;  %v1992_v57 = vmul.f32 %v3387_v52, %v3371_v30 }
 0xac0   :  { %v3389_v53 = vpop.eup %3388  ;;  %3266 = vmatpush3.msra.mxu0 %v2510_v51 }
 0xac1   :  { %3267 = vmatprep.subr.mxu0 %v2508_v55  ;;  %v1991_v27 = vmul.f32 %v3389_v53, %v3373_v33 }
 0xac2   :  { %3268 = vmatpush3.msra.mxu0 %v2508_v55 }
 0xac3   :  { %3269 = vmatprep.mubr.msk.f32.mxu0 %vm645_vm10, %v1991_v27  ;;  %3277 = vmatprep.subr.mxu0 %v78_v54 }
 0xac4   :  { %3270 = vmatmul.mubr.msk.f32.vlgmr.msra.gmra.mxu0 %vm645_vm10, %v1992_v57 }
 0xac5   :  { %3278 = vmatpush3.msra.mxu0 %v78_v54 }
 0xac6   :  { %3279 = vmatprep.subr.mxu0 %v72_v46 }
 0xac7   :  { %3280 = vmatpush3.msra.mxu0 %v72_v46 }
 0xac8   :  { %3281 = vmatprep.subr.mxu0 %v66_v47 }
 0xac9   :  { %3282 = vmatpush3.msra.mxu0 %v66_v47 }
 0xaca   :  { %3283 = vmatprep.subr.mxu0 %v60_v2 }
 0xacb   :  { %3284 = vmatpush3.msra.mxu0 %v60_v2 }
 0xb77   :  { %v3235_v60 = vpop.f32.mrf.mxu1 }
 0xb79   :  { %v2075_v61 = vpop.f32.mrf.mxu1 }
 0xb7a   :  { %3238 = vmatprep.mubr.msk.f32.mxu1 %vm280_vm1, %v2075_v61  ;;  %v73_v61 = vld [vmem:[#allocation5 + $0x88] sm:$0xff] }
 0xb7b   :  { %3239 = vmatmul.mubr.msk.f32.vlgmr.msra.gmra.mxu1 %vm280_vm1, %v3235_v60  ;;  %v3247_v3 = vpop.f32.mrf.mxu0  ;;  %v79_v60 = vld [vmem:[#allocation5 + $0xb8] sm:$0xff] }
 0xb7c   :  { %3249 = vmatpush3.msra.mxu1 %v65_v59 }
 0xb7d   :  { %v2245_v4 = vpop.f32.mrf.mxu0  ;;  %3260 = vmatprep.subr.mxu1 %v71_v62 }
 0xb7e   :  { %3250 = vmatprep.mubr.msk.f32.mxu1 %vm280_vm1, %v2245_v4  ;;  %v2711_v4 = vsub.s32 4, %v3550_v25 }
 0xb7f   :  { %3251 = vmatmul.mubr.msk.f32.vlgmr.msra.gmra.mxu1 %vm280_vm1, %v3247_v3  ;;  %v3259_v7 = vpop.f32.mrf.mxu0  ;;  %v61_v3 = vld [vmem:[#allocation5 + $0x28] sm:$0xff] }
 0xb80   :  { %3261 = vmatpush3.msra.mxu1 %v71_v62  ;;  %v67_v62 = vld [vmem:[#allocation5 + $0x58] sm:$0xff] }
 0xb81   :  { %v2415_v9 = vpop.f32.mrf.mxu0  ;;  %3272 = vmatprep.subr.mxu1 %v77_v5 }
 0xb82   :  { %3262 = vmatprep.mubr.msk.f32.mxu1 %vm280_vm1, %v2415_v9 }
 0xb83   :  { %3263 = vmatmul.mubr.msk.f32.vlgmr.msra.gmra.mxu1 %vm280_vm1, %v3259_v7 }
 0xb84   :  { %v3271_v44 = vpop.f32.mrf.mxu0  ;;  %3273 = vmatpush3.msra.mxu1 %v77_v5 }
 0xb85   :  { %3288 = vmatprep.subr.mxu1 %v79_v60 }
 0xb86   :  { %v2585_v42 = vpop.f32.mrf.mxu0 }
 0xb87   :  { %3274 = vmatprep.mubr.msk.f32.mxu1 %vm280_vm1, %v2585_v42 }
 0xb88   :  { %3275 = vmatmul.mubr.msk.f32.vlgmr.msra.gmra.mxu1 %vm280_vm1, %v3271_v44 }
 0xb89   :  { %3289 = vmatpush3.msra.mxu1 %v79_v60 }
 0xb8a   :  { %3290 = vmatprep.subr.mxu1 %v73_v61 }
 0xb8b   :  { %3291 = vmatpush3.msra.mxu1 %v73_v61 }
 0xb8c   :  { %3292 = vmatprep.subr.mxu1 %v67_v62 }
 0xb8d   :  { %3293 = vmatpush3.msra.mxu1 %v67_v62 }
 0xb8e   :  { %3294 = vmatprep.subr.mxu1 %v61_v3 }
 0xb8f   :  { %3295 = vmatpush3.msra.mxu1 %v61_v3 }
 0xc3b   :  { %v3240_v15 = vpop.f32.mrf.mxu1 }
 0xc3c   :  { %v2166_v22 = vadd.f32 %v3240_v15, %v1996_v20 }
 0xc3d   :  { %v2156_v16 = vpop.f32.mrf.mxu1 }
 0xc3e   :  { %v2165_v63 = vadd.f32 %v2156_v16, %v1996_v20 }
 0xc3f   :  { %v3252_v21 = vpop.f32.mrf.mxu1 }
 0xc40   :  { %v2336_v18 = vadd.f32 %v3252_v21, %v2166_v22 }
 0xc41   :  { %v2326_v1 = vpop.f32.mrf.mxu1 }
 0xc42   :  { %v2335_v24 = vadd.f32 %v2326_v1, %v2165_v63 }
 0xc43   :  { %v3264_v0 = vpop.f32.mrf.mxu1 }
 0xc44   :  { %v2506_v6 = vadd.f32 %v3264_v0, %v2336_v18 }
 0xc45   :  { %v2496_v26 = vpop.f32.mrf.mxu1 }
 0xc46   :  { %v2505_v28 = vadd.f32 %v2496_v26, %v2335_v24 }
 0xc48   :  { %v3276_v8 = vpop.f32.mrf.mxu1 }
 0xc49   :  { %v2676_v30 = vadd.f32 %v3276_v8, %v2506_v6 }
 0xc4a   :  { %v2666_v32 = vpop.f32.mrf.mxu1 }
 0xc4b   :  { %v3949_v33 = vadd.f32 %v2676_v30, %v3777_v10  ;;  %v2675_v14 = vadd.f32 %v2666_v32, %v2505_v28  ;;  %v2814_v32 = vsub.s32 5, %v3550_v25 }
 0xc4d   :  { %v3952_v34 = vadd.f32 %v2675_v14, %v3780_v11  ;;  %v2682_v35 = vsel %vm157_vm0, %v3949_v33, 0.0  ;;  %v2815_v14 = vrot.slane %v3945_v17, %v2814_v32 }
 0xc4e   :  { %2683 = vadd.xlane.f32.xlu1 %v2682_v35 }
 0xc4f   :  { %v2679_v37 = vsel %vm157_vm0, %v3952_v34, 0.0 }
 0xc50   :  { %2680 = vadd.xlane.f32.xlu0 %v2679_v37 }
 0xcd7   :  { %v2684_v19 = vpop.xlane.xlu1 %2683 }
 0xcd8   :  { %v2686_v38 = vmul.f32 0.03125, %v2684_v19 }
 0xcd9   :  { %v2681_v40 = vpop.xlane.xlu0 %2680 }
 0xcda   :  { %v2685_v23 = vmul.f32 0.03125, %v2681_v40  ;;  %v2688_v41 = vsub.f32 %v3949_v33, %v2686_v38 }
 0xcdc   :  { %v2687_v10 = vsub.f32 %v3952_v34, %v2685_v23  ;;  %v2690_v56 = vmul.f32 %v2688_v41, %v2688_v41 }
 0xcde   :  { %v2689_v43 = vmul.f32 %v2687_v10, %v2687_v10  ;;  %v2694_v45 = vsel %vm157_vm0, %v2690_v56, 0.0 }
 0xce0   :  { %v2691_v11 = vsel %vm157_vm0, %v2689_v43, 0.0 }
 0xce1   :  { %2692 = vadd.xlane.f32.xlu0 %v2691_v11 }
 0xce5   :  { %2695 = vadd.xlane.f32.xlu0 %v2694_v45 }
 0xd6a   :  { %v2693_v12 = vpop.xlane.xlu0 %2692 }
 0xd6b   :  { %v2697_v36 = vmul.f32 0.03125, %v2693_v12 }
 0xd6d   :  { %v2699_v39 = vadd.f32 1e-05, %v2697_v36 }
 0xd6e   :  { %v2696_v48 = vpop.xlane.xlu0 %2695 }
 0xd6f   :  { %3390 = vrsqrt.f32 %v2699_v39  ;;  %v2698_v49 = vmul.f32 0.03125, %v2696_v48 }
 0xd71   :  { %v2700_v50 = vadd.f32 1e-05, %v2698_v49 }
 0xd73   :  { %3392 = vrsqrt.f32 %v2700_v50 }
 0xd7c   :  { %v3391_v51 = vpop.eup %3390 }
 0xd7d   :  { %v2703_v52 = vmul.f32 %v3391_v51, %v2687_v10 }
 0xd7f   :  { %v2705_v53 = vmul.f32 %v2703_v52, %v3557_v29 }
 0xd80   :  { %v3393_v55 = vpop.eup %3392 }
 0xd81   :  { %v2704_v27 = vmul.f32 %v3393_v55, %v2688_v41  ;;  %v2707_v57 = vadd.f32 %v2705_v53, %v3560_v31 }
 0xd83   :  { %3285 = vmatprep.mubr.msk.f32.mxu0 %vm157_vm0, %v2707_v57  ;;  %v2706_v58 = vmul.f32 %v2704_v27, %v3557_v29  ;;  %v2712_v29 = vrot.slane %v3945_v17, %v2711_v4 }
 0xd85   :  { %v2708_v59 = vadd.f32 %v2706_v58, %v3560_v31 }
 0xd87   :  { %3286 = vmatmul.mubr.msk.f32.vlgmr.msra.gmra.mxu0 %vm157_vm0, %v2708_v59 }
 0xe47   :  { %v3287_v5 = vpop.f32.mrf.mxu0 }
 0xe48   :  { %v2791_v31 = vadd.f32 %v3287_v5, %v2712_v29 }
 0xe49   :  { %v2785_v7 = vpop.f32.mrf.mxu0 }
 0xe4a   :  { %v2797_v9 = vmul.f32 0.044715, %v2791_v31  ;;  %v2786_v44 = vadd.f32 %v2785_v7, %v2712_v29  ;;  %v2795_v8 = vmul.f32 0.5, %v2791_v31 }
 0xe4c   :  { %v2799_v42 = vmul.f32 %v2797_v9, %v2791_v31  ;;  %v2796_v13 = vmul.f32 0.044715, %v2786_v44  ;;  %v2794_v24 = vmul.f32 0.5, %v2786_v44 }
 0xe4e   :  { %v2801_v15 = vmul.f32 %v2799_v42, %v2791_v31  ;;  %v2798_v16 = vmul.f32 %v2796_v13, %v2786_v44 }
 0xe50   :  { %v2803_v20 = vadd.f32 %v2801_v15, %v2791_v31  ;;  %v2800_v21 = vmul.f32 %v2798_v16, %v2786_v44 }
 0xe52   :  { %v2805_v1 = vmul.f32 0.7978846, %v2803_v20  ;;  %v2802_v22 = vadd.f32 %v2800_v21, %v2786_v44 }
 0xe54   :  { %3394 = vtanh.f32 %v2805_v1  ;;  %v2804_v0 = vmul.f32 0.7978846, %v2802_v22 }
 0xe56   :  { %3396 = vtanh.f32 %v2804_v0 }
 0xe61   :  { %v3395_v63 = vpop.eup %3394 }
 0xe62   :  { %v2809_v26 = vadd.f32 1.0, %v3395_v63 }
 0xe63   :  { %v3397_v18 = vpop.eup %3396 }
 0xe64   :  { %v2808_v6 = vadd.f32 1.0, %v3397_v18  ;;  %v2811_v30 = vmul.f32 %v2809_v26, %v2795_v8 }
 0xe66   :  { %v2810_v28 = vmul.f32 %v2808_v6, %v2794_v24 }
 0xe68   :  { %3296 = vmatprep.mubr.msk.f32.mxu1 %vm157_vm0, %v2810_v28 }
 0xe69   :  { %3297 = vmatmul.mubr.msk.f32.vlgmr.msra.gmra.mxu1 %vm157_vm0, %v2811_v30 }
 0xf29   :  { %v3298_v35 = vpop.f32.mrf.mxu1 }
 0xf2a   :  { %v2894_v37 = vadd.f32 %v3298_v35, %v2815_v14 }
 0xf2b   :  { %v2888_v19 = vpop.f32.mrf.mxu1 }
 0xf2c   :  { %v2898_v38 = vadd.f32 %v2894_v37, %v3949_v33  ;;  %v2889_v40 = vadd.f32 %v2888_v19, %v2815_v14 }
 0xf2e   :  { %2900 = vst.msk [vmem:[#allocation8 + $0x8] sm:$0xff] %vm157_vm0, %v2898_v38  ;;  %v2897_v23 = vadd.f32 %v2889_v40, %v3952_v34 }
 0xf30   :  { %2899 = vst.msk [vmem:[#allocation8] sm:$0xff] %vm157_vm0, %v2897_v23 }
 0xf31   :  { %3470 = shalt.err (!%p3467_p5)
}
 0xf32   :  { %2912 = dma.vmem_to_hbm [thread:$0]  %s2907_s12, 256, %s3987_s3, [#allocation4], %s3489_s22, %s3489_s22, %s3490_s23  }
 0xf33   :  { %3483 = dma.done.wait [#allocation4], 256  }
 0xf34   :  { %3484 = vsyncadd [#allocation4], 4294967040 }
 0xf35   :  { %2916 = vsyncpa [#allocation3], 1 }
 0xf36   :  { %2917 = vsyncpa [#allocation6], 1 }
 0xf37   :  { %2918 = vsyncpa [#allocation4], 1 }

</bundles_post_ra>
